<compile_context>
chip_gen: v7x
topology: tpu7x:2x2x1
jax: 0.10.0
libtpu: 0.0.40
codegen_flags: <defaults>
</compile_context>

<pallas_src>
import jax
import jax.numpy as jnp
from jax import lax
from jax.experimental import pallas as pl
from jax.experimental.pallas import tpu as pltpu


# ----------------------------- kernel ---------------------------------------


def _lstm_fc_kernel(xb_ref,       # (T+1, TB, 8H) precomputed gate preacts (x@wih0+b0 | b1), interleaved
                    whh_ref,      # (2H, 8H)  fused recurrence weight [[whh0, wih1],[0, whh1]], interleaved
                    fcw1_ref,     # (H, 32)
                    fcb1_ref,     # (1, 32)
                    fcw2_ref,     # (1, 32)   (transposed fc2 weight, used on the VPU)
                    fcb2_ref,     # (1, 1)
                    out_ref):     # (TB, 1)
    steps, TB, H8 = xb_ref.shape
    H2 = H8 // 4              # packed per-gate width = 2H (layer0 | layer1) = 128 lanes
    H = H2 // 2

    whh = whh_ref[...]        # loop-invariant; hoisted out of the serial loop

    def body(k, carry):
        # carry before iteration k:  hpack = [h0(k-1) | h1(k-2)], cpack likewise.
        hpack, cpack = carry
        # Single fused MXU matmul per step: layer-0 recurrence AND layer-1
        # (input + recurrence) preactivations for the skewed step k-1.
        rec = jnp.dot(hpack, whh, preferred_element_type=jnp.float32)   # (TB, 8H)
        pre = rec + xb_ref[k]                                           # (TB, 8H)
        # Gate layout [i0 i1 | f0 f1 | o0 o1 | g0 g1]: one sigmoid over 6H
        # lanes, one tanh over 2H lanes, then full-128-lane cell updates.
        sig = jax.nn.sigmoid(pre[:, 0:3 * H2])
        g_pk = jnp.tanh(pre[:, 3 * H2:4 * H2])
        i_pk = sig[:, 0:H2]
        f_pk = sig[:, H2:2 * H2]
        o_pk = sig[:, 2 * H2:3 * H2]
        c_new = f_pk * cpack + i_pk * g_pk
        h_new = o_pk * jnp.tanh(c_new)
        # new carry: hpack = [h0(k) | h1(k-1)]
        return (h_new, c_new)

    z = jnp.zeros((TB, H2), jnp.float32)
    unroll = steps if steps <= 16 else 8
    hpack, _ = lax.fori_loop(0, steps, body, (z, z), unroll=unroll)

    # After the final (dummy layer-0) step, hpack[:, H:2H] = h1(T-1).
    h1_last = hpack[:, H:2 * H]
    fc1 = (jnp.dot(h1_last, fcw1_ref[...], preferred_element_type=jnp.float32)
           + fcb1_ref[...])
    fc1 = jnp.maximum(fc1, 0.0)
    # (TB,32)x(32,1) as a VPU multiply + lane reduction (no MXU round-trip).
    out_ref[...] = (jnp.sum(fc1 * fcw2_ref[...], axis=-1, keepdims=True)
                    + fcb2_ref[...])


# --------------------------- host-side weight prep ---------------------------


def _permute_gates(w, H):
    """Reorder the fused 4H gate axis from PyTorch [i,f,g,o] to [i,f,o,g]."""
    return jnp.concatenate(
        [w[..., 0:2 * H], w[..., 3 * H:4 * H], w[..., 2 * H:3 * H]], axis=-1)


def _interleave_gate_cols(a, b, H):
    """(K,4H),(K,4H) -> (K,8H) columns [iA iB | fA fB | oA oB | gA gB]."""
    K = a.shape[0]
    return jnp.stack([a.reshape(K, 4, H), b.reshape(K, 4, H)],
                     axis=2).reshape(K, 8 * H)


def prepare_kernel_params(params):
    """Gate reorder + wavefront-skewed fused recurrence weight."""
    H = params["whh0"].shape[0]
    wih0 = _permute_gates(params["wih0"], H)
    whh0 = _permute_gates(params["whh0"], H)
    b0 = _permute_gates(params["b0"], H)
    wih1 = _permute_gates(params["wih1"], H)
    whh1 = _permute_gates(params["whh1"], H)
    b1 = _permute_gates(params["b1"], H)
    # rows 0:H multiply h0(k-1); rows H:2H multiply h1(k-2).
    top = _interleave_gate_cols(whh0, wih1, H)                  # h0 -> layer0 rec, layer1 input
    bot = _interleave_gate_cols(jnp.zeros_like(whh1), whh1, H)  # h1 -> layer1 rec only
    whh_blk = jnp.concatenate([top, bot], axis=0)               # (2H, 8H)
    return {
        "wih0": wih0, "b0": b0, "b1": b1, "whh_blk": whh_blk,
        "fcw1": params["fcw1"], "fcb1": params["fcb1"],
        "fcw2_row": params["fcw2"].T,   # (1, 32)
        "fcb2": params["fcb2"],
    }


def _round_up(n, m):
    return ((n + m - 1) // m) * m


def lstm_model_forward(x, params):
    """x: (B, T, I) float32, batch-first (PyTorch layout). Returns (B, 1)."""
    B, T, I = x.shape
    H = params["whh0"].shape[0]
    H4 = 4 * H
    kp = prepare_kernel_params(params)

    # Pad batch to the f32 sublane (8).  Cap the batch tile at 64 rows and,
    # when the batch allows, take >=2 tiles so the "parallel" grid axis can
    # shard across both TensorCores on v7x (no-op on v5e/v6e).
    B8 = _round_up(B, 8)
    if B8 <= 8:
        TB = B8
    else:
        TB = min(64, _round_up((B8 + 1) // 2, 8))
    B_pad = _round_up(B8, TB)
    x_p = x if B_pad == B else jnp.pad(x, ((0, B_pad - B), (0, 0), (0, 0)))

    # Precompute (off the serial critical path) all per-step gate preacts that
    # do not depend on hidden state, time-major:
    #   layer-0 columns: x_t @ wih0 + b0  (step T is a dummy layer-0 step)
    #   layer-1 columns: b1 (its "input" h0 arrives through the fused matmul)
    xproj0 = jnp.einsum("bti,ih->tbh", x_p, kp["wih0"]) + kp["b0"]       # (T, Bp, 4H)
    xproj0 = jnp.concatenate(
        [xproj0, jnp.zeros((1, B_pad, H4), jnp.float32)], axis=0)        # (T+1, Bp, 4H)
    xproj1 = jnp.broadcast_to(kp["b1"], (T + 1, B_pad, H4))
    # Step 0: layer 1 must stay at its zero initial state.  Force its input
    # gate preact to -1e9 (sigmoid -> 0  =>  c1 = 0  =>  h1 = 0).
    xproj1 = xproj1.at[0, :, 0:H].set(-1e9)
    # Interleave per-layer gate columns: [i0 i1 | f0 f1 | o0 o1 | g0 g1].
    xb = jnp.stack([xproj0.reshape(T + 1, B_pad, 4, H),
                    xproj1.reshape(T + 1, B_pad, 4, H)],
                   axis=3).reshape(T + 1, B_pad, 8 * H)

    grid = (B_pad // TB,)
    in_specs = [
        pl.BlockSpec((T + 1, TB, 8 * H), lambda b: (0, b, 0)),   # xb (batch-tiled)
        pl.BlockSpec((2 * H, 8 * H), lambda b: (0, 0)),          # fused recurrence weight
        pl.BlockSpec((H, 32), lambda b: (0, 0)),                 # fcw1
        pl.BlockSpec((1, 32), lambda b: (0, 0)),                 # fcb1
        pl.BlockSpec((1, 32), lambda b: (0, 0)),                 # fcw2 (row)
        pl.BlockSpec((1, 1), lambda b: (0, 0)),                  # fcb2
    ]
    out_spec = pl.BlockSpec((TB, 1), lambda b: (b, 0))

    out_pad = pl.pallas_call(
        _lstm_fc_kernel,
        out_shape=jax.ShapeDtypeStruct((B_pad, 1), jnp.float32),
        grid=grid,
        in_specs=in_specs,
        out_specs=out_spec,
        compiler_params=pltpu.CompilerParams(
            dimension_semantics=("parallel",)),
    )(xb, kp["whh_blk"], kp["fcw1"], kp["fcb1"], kp["fcw2_row"], kp["fcb2"])

    return out_pad[:B]


# ----------------------------- params / reference ----------------------------


def init_params(key, input_size=1, hidden_size=64):
    """Deterministic init mimicking PyTorch uniform(-1/sqrt(fan), 1/sqrt(fan)).
    Weights are stored pre-transposed for (B, K) @ (K, N) matmuls; LSTM biases
    (ih + hh) are pre-summed. Gate order here is PyTorch-standard [i, f, g, o];
    the kernel-side reorder happens in prepare_kernel_params."""
    H = hidden_size
    ks = jax.random.split(key, 12)
    k_lstm = 1.0 / jnp.sqrt(H)

    def u(k, shape, bound):
        return jax.random.uniform(k, shape, jnp.float32, -bound, bound)

    params = {
        # layer 0: input_size -> H
        "wih0": u(ks[0], (input_size, 4 * H), k_lstm),
        "whh0": u(ks[1], (H, 4 * H), k_lstm),
        "b0":   u(ks[2], (1, 4 * H), k_lstm) + u(ks[3], (1, 4 * H), k_lstm),
        # layer 1: H -> H
        "wih1": u(ks[4], (H, 4 * H), k_lstm),
        "whh1": u(ks[5], (H, 4 * H), k_lstm),
        "b1":   u(ks[6], (1, 4 * H), k_lstm) + u(ks[7], (1, 4 * H), k_lstm),
        # fc: H -> 32 -> 1
        "fcw1": u(ks[8], (H, 32), 1.0 / jnp.sqrt(H)),
        "fcb1": u(ks[9], (1, 32), 1.0 / jnp.sqrt(H)),
        "fcw2": u(ks[10], (32, 1), 1.0 / jnp.sqrt(32.0)),
        "fcb2": u(ks[11], (1, 1), 1.0 / jnp.sqrt(32.0)),
    }
    return params


def reference_forward(x, params):
    """Pure-JAX reference of the PyTorch forward (for validation)."""
    B, T, I = x.shape
    H = params["whh0"].shape[0]

    def cell(x_t, h, c, wih, whh, b):
        pre = x_t @ wih + h @ whh + b
        i = jax.nn.sigmoid(pre[:, 0:H])
        f = jax.nn.sigmoid(pre[:, H:2 * H])
        g = jnp.tanh(pre[:, 2 * H:3 * H])
        o = jax.nn.sigmoid(pre[:, 3 * H:4 * H])
        c_new = f * c + i * g
        return o * jnp.tanh(c_new), c_new

    h0 = c0 = h1 = c1 = jnp.zeros((B, H), jnp.float32)
    for t in range(T):
        h0, c0 = cell(x[:, t, :], h0, c0, params["wih0"], params["whh0"], params["b0"])
        h1, c1 = cell(h0, h1, c1, params["wih1"], params["whh1"], params["b1"])
    z = jnp.maximum(h1 @ params["fcw1"] + params["fcb1"], 0.0)
    return z @ params["fcw2"] + params["fcb2"]


if __name__ == "__main__":
    key = jax.random.PRNGKey(0)
    k_x, k_p = jax.random.split(key)

    B, T, I, H = 2, 8, 1, 64
    x = jax.random.normal(k_x, (B, T, I), jnp.float32)
    params = init_params(k_p, input_size=I, hidden_size=H)

    fwd = jax.jit(lstm_model_forward)
    out = jax.block_until_ready(fwd(x, params))
    ref = jax.block_until_ready(reference_forward(x, params))

    assert out.shape == (B, 1), out.shape
    assert jnp.allclose(out, ref, atol=1e-4, rtol=1e-4), (out, ref)
    print("KERNEL_OK")
</pallas_src>

<mosaic_0001>
module attributes {stable_mosaic.version = 11 : i64} {
  func.func @_lstm_fc_kernel(%arg0: i32, %arg1: memref<9x8x512xf32, #tpu.memory_space<vmem>>, %arg2: memref<128x512xf32, #tpu.memory_space<vmem>>, %arg3: memref<64x32xf32, #tpu.memory_space<vmem>>, %arg4: memref<1x32xf32, #tpu.memory_space<vmem>>, %arg5: memref<1x32xf32, #tpu.memory_space<vmem>>, %arg6: memref<1x1xf32, #tpu.memory_space<vmem>>, %arg7: memref<8x1xf32, #tpu.memory_space<vmem>>) attributes {dimension_semantics = [#tpu.dimension_semantics<parallel>], iteration_bounds = array<i64: 1>, scalar_prefetch = 0 : i64, scratch_operands = 0 : i64, tpu.core_type = #tpu.core_type<tc>, window_params = [{transform_indices = @transform_0, window_bounds = array<i64: 9, 8, 512>}, {pipeline_mode = #tpu.pipeline_mode<synchronous>, transform_indices = @transform_1, window_bounds = array<i64: 128, 512>}, {pipeline_mode = #tpu.pipeline_mode<synchronous>, transform_indices = @transform_2, window_bounds = array<i64: 64, 32>}, {pipeline_mode = #tpu.pipeline_mode<synchronous>, transform_indices = @transform_3, window_bounds = array<i64: 1, 32>}, {pipeline_mode = #tpu.pipeline_mode<synchronous>, transform_indices = @transform_4, window_bounds = array<i64: 1, 32>}, {pipeline_mode = #tpu.pipeline_mode<synchronous>, transform_indices = @transform_5, window_bounds = array<i64: 1, 1>}, {transform_indices = @transform_6, window_bounds = array<i64: 8, 1>}]} {
    %c0 = arith.constant 0 : index
    %c0_0 = arith.constant 0 : index
    %0 = vector.load %arg2[%c0, %c0_0] : memref<128x512xf32, #tpu.memory_space<vmem>>, vector<128x512xf32>
    %cst = arith.constant 0.000000e+00 : f32
    %1 = vector.broadcast %cst : f32 to vector<8x128xf32>
    %c0_i32 = arith.constant 0 : i32
    %cst_1 = arith.constant dense<0.000000e+00> : vector<8x512xf32>
    %2 = tpu.matmul %1, %0, %cst_1 {dimension_numbers = #tpu.dot_dimension_numbers<[1], [0], [0], [1], [0, 0, 1, 1], [], []>} : vector<8x128xf32>, vector<128x512xf32>, vector<8x512xf32> -> vector<8x512xf32>
    %3 = arith.index_cast %c0_i32 : i32 to index
    %c0_2 = arith.constant 0 : index
    %c0_3 = arith.constant 0 : index
    %4 = vector.load %arg1[%3, %c0_2, %c0_3] : memref<9x8x512xf32, #tpu.memory_space<vmem>>, vector<1x8x512xf32>
    %5 = vector.shape_cast %4 : vector<1x8x512xf32> to vector<8x512xf32>
    %6 = arith.addf %2, %5 : vector<8x512xf32>
    %7 = vector.extract_strided_slice %6 {offsets = [0, 0], sizes = [8, 384], strides = [1, 1]} : vector<8x512xf32> to vector<8x384xf32>
    %8 = arith.negf %7 : vector<8x384xf32>
    %9 = math.exp %8 : vector<8x384xf32>
    %cst_4 = arith.constant 1.000000e+00 : f32
    %10 = vector.broadcast %cst_4 : f32 to vector<8x384xf32>
    %11 = arith.addf %10, %9 : vector<8x384xf32>
    %12 = arith.divf %10, %11 : vector<8x384xf32>
    %13 = vector.extract_strided_slice %6 {offsets = [0, 384], sizes = [8, 128], strides = [1, 1]} : vector<8x512xf32> to vector<8x128xf32>
    %14 = math.tanh %13 : vector<8x128xf32>
    %15 = vector.extract_strided_slice %12 {offsets = [0, 0], sizes = [8, 128], strides = [1, 1]} : vector<8x384xf32> to vector<8x128xf32>
    %16 = vector.extract_strided_slice %12 {offsets = [0, 128], sizes = [8, 128], strides = [1, 1]} : vector<8x384xf32> to vector<8x128xf32>
    %17 = vector.extract_strided_slice %12 {offsets = [0, 256], sizes = [8, 128], strides = [1, 1]} : vector<8x384xf32> to vector<8x128xf32>
    %18 = arith.mulf %16, %1 : vector<8x128xf32>
    %19 = arith.mulf %15, %14 : vector<8x128xf32>
    %20 = arith.addf %18, %19 : vector<8x128xf32>
    %21 = math.tanh %20 : vector<8x128xf32>
    %22 = arith.mulf %17, %21 : vector<8x128xf32>
    %c1_i32 = arith.constant 1 : i32
    %cst_5 = arith.constant dense<0.000000e+00> : vector<8x512xf32>
    %23 = tpu.matmul %22, %0, %cst_5 {dimension_numbers = #tpu.dot_dimension_numbers<[1], [0], [0], [1], [0, 0, 1, 1], [], []>} : vector<8x128xf32>, vector<128x512xf32>, vector<8x512xf32> -> vector<8x512xf32>
    %24 = arith.index_cast %c1_i32 : i32 to index
    %c0_6 = arith.constant 0 : index
    %c0_7 = arith.constant 0 : index
    %25 = vector.load %arg1[%24, %c0_6, %c0_7] : memref<9x8x512xf32, #tpu.memory_space<vmem>>, vector<1x8x512xf32>
    %26 = vector.shape_cast %25 : vector<1x8x512xf32> to vector<8x512xf32>
    %27 = arith.addf %23, %26 : vector<8x512xf32>
    %28 = vector.extract_strided_slice %27 {offsets = [0, 0], sizes = [8, 384], strides = [1, 1]} : vector<8x512xf32> to vector<8x384xf32>
    %29 = arith.negf %28 : vector<8x384xf32>
    %30 = math.exp %29 : vector<8x384xf32>
    %cst_8 = arith.constant 1.000000e+00 : f32
    %31 = vector.broadcast %cst_8 : f32 to vector<8x384xf32>
    %32 = arith.addf %31, %30 : vector<8x384xf32>
    %33 = arith.divf %31, %32 : vector<8x384xf32>
    %34 = vector.extract_strided_slice %27 {offsets = [0, 384], sizes = [8, 128], strides = [1, 1]} : vector<8x512xf32> to vector<8x128xf32>
    %35 = math.tanh %34 : vector<8x128xf32>
    %36 = vector.extract_strided_slice %33 {offsets = [0, 0], sizes = [8, 128], strides = [1, 1]} : vector<8x384xf32> to vector<8x128xf32>
    %37 = vector.extract_strided_slice %33 {offsets = [0, 128], sizes = [8, 128], strides = [1, 1]} : vector<8x384xf32> to vector<8x128xf32>
    %38 = vector.extract_strided_slice %33 {offsets = [0, 256], sizes = [8, 128], strides = [1, 1]} : vector<8x384xf32> to vector<8x128xf32>
    %39 = arith.mulf %37, %20 : vector<8x128xf32>
    %40 = arith.mulf %36, %35 : vector<8x128xf32>
    %41 = arith.addf %39, %40 : vector<8x128xf32>
    %42 = math.tanh %41 : vector<8x128xf32>
    %43 = arith.mulf %38, %42 : vector<8x128xf32>
    %c2_i32 = arith.constant 2 : i32
    %cst_9 = arith.constant dense<0.000000e+00> : vector<8x512xf32>
    %44 = tpu.matmul %43, %0, %cst_9 {dimension_numbers = #tpu.dot_dimension_numbers<[1], [0], [0], [1], [0, 0, 1, 1], [], []>} : vector<8x128xf32>, vector<128x512xf32>, vector<8x512xf32> -> vector<8x512xf32>
    %45 = arith.index_cast %c2_i32 : i32 to index
    %c0_10 = arith.constant 0 : index
    %c0_11 = arith.constant 0 : index
    %46 = vector.load %arg1[%45, %c0_10, %c0_11] : memref<9x8x512xf32, #tpu.memory_space<vmem>>, vector<1x8x512xf32>
    %47 = vector.shape_cast %46 : vector<1x8x512xf32> to vector<8x512xf32>
    %48 = arith.addf %44, %47 : vector<8x512xf32>
    %49 = vector.extract_strided_slice %48 {offsets = [0, 0], sizes = [8, 384], strides = [1, 1]} : vector<8x512xf32> to vector<8x384xf32>
    %50 = arith.negf %49 : vector<8x384xf32>
    %51 = math.exp %50 : vector<8x384xf32>
    %cst_12 = arith.constant 1.000000e+00 : f32
    %52 = vector.broadcast %cst_12 : f32 to vector<8x384xf32>
    %53 = arith.addf %52, %51 : vector<8x384xf32>
    %54 = arith.divf %52, %53 : vector<8x384xf32>
    %55 = vector.extract_strided_slice %48 {offsets = [0, 384], sizes = [8, 128], strides = [1, 1]} : vector<8x512xf32> to vector<8x128xf32>
    %56 = math.tanh %55 : vector<8x128xf32>
    %57 = vector.extract_strided_slice %54 {offsets = [0, 0], sizes = [8, 128], strides = [1, 1]} : vector<8x384xf32> to vector<8x128xf32>
    %58 = vector.extract_strided_slice %54 {offsets = [0, 128], sizes = [8, 128], strides = [1, 1]} : vector<8x384xf32> to vector<8x128xf32>
    %59 = vector.extract_strided_slice %54 {offsets = [0, 256], sizes = [8, 128], strides = [1, 1]} : vector<8x384xf32> to vector<8x128xf32>
    %60 = arith.mulf %58, %41 : vector<8x128xf32>
    %61 = arith.mulf %57, %56 : vector<8x128xf32>
    %62 = arith.addf %60, %61 : vector<8x128xf32>
    %63 = math.tanh %62 : vector<8x128xf32>
    %64 = arith.mulf %59, %63 : vector<8x128xf32>
    %c3_i32 = arith.constant 3 : i32
    %cst_13 = arith.constant dense<0.000000e+00> : vector<8x512xf32>
    %65 = tpu.matmul %64, %0, %cst_13 {dimension_numbers = #tpu.dot_dimension_numbers<[1], [0], [0], [1], [0, 0, 1, 1], [], []>} : vector<8x128xf32>, vector<128x512xf32>, vector<8x512xf32> -> vector<8x512xf32>
    %66 = arith.index_cast %c3_i32 : i32 to index
    %c0_14 = arith.constant 0 : index
    %c0_15 = arith.constant 0 : index
    %67 = vector.load %arg1[%66, %c0_14, %c0_15] : memref<9x8x512xf32, #tpu.memory_space<vmem>>, vector<1x8x512xf32>
    %68 = vector.shape_cast %67 : vector<1x8x512xf32> to vector<8x512xf32>
    %69 = arith.addf %65, %68 : vector<8x512xf32>
    %70 = vector.extract_strided_slice %69 {offsets = [0, 0], sizes = [8, 384], strides = [1, 1]} : vector<8x512xf32> to vector<8x384xf32>
    %71 = arith.negf %70 : vector<8x384xf32>
    %72 = math.exp %71 : vector<8x384xf32>
    %cst_16 = arith.constant 1.000000e+00 : f32
    %73 = vector.broadcast %cst_16 : f32 to vector<8x384xf32>
    %74 = arith.addf %73, %72 : vector<8x384xf32>
    %75 = arith.divf %73, %74 : vector<8x384xf32>
    %76 = vector.extract_strided_slice %69 {offsets = [0, 384], sizes = [8, 128], strides = [1, 1]} : vector<8x512xf32> to vector<8x128xf32>
    %77 = math.tanh %76 : vector<8x128xf32>
    %78 = vector.extract_strided_slice %75 {offsets = [0, 0], sizes = [8, 128], strides = [1, 1]} : vector<8x384xf32> to vector<8x128xf32>
    %79 = vector.extract_strided_slice %75 {offsets = [0, 128], sizes = [8, 128], strides = [1, 1]} : vector<8x384xf32> to vector<8x128xf32>
    %80 = vector.extract_strided_slice %75 {offsets = [0, 256], sizes = [8, 128], strides = [1, 1]} : vector<8x384xf32> to vector<8x128xf32>
    %81 = arith.mulf %79, %62 : vector<8x128xf32>
    %82 = arith.mulf %78, %77 : vector<8x128xf32>
    %83 = arith.addf %81, %82 : vector<8x128xf32>
    %84 = math.tanh %83 : vector<8x128xf32>
    %85 = arith.mulf %80, %84 : vector<8x128xf32>
    %c4_i32 = arith.constant 4 : i32
    %cst_17 = arith.constant dense<0.000000e+00> : vector<8x512xf32>
    %86 = tpu.matmul %85, %0, %cst_17 {dimension_numbers = #tpu.dot_dimension_numbers<[1], [0], [0], [1], [0, 0, 1, 1], [], []>} : vector<8x128xf32>, vector<128x512xf32>, vector<8x512xf32> -> vector<8x512xf32>
    %87 = arith.index_cast %c4_i32 : i32 to index
    %c0_18 = arith.constant 0 : index
    %c0_19 = arith.constant 0 : index
    %88 = vector.load %arg1[%87, %c0_18, %c0_19] : memref<9x8x512xf32, #tpu.memory_space<vmem>>, vector<1x8x512xf32>
    %89 = vector.shape_cast %88 : vector<1x8x512xf32> to vector<8x512xf32>
    %90 = arith.addf %86, %89 : vector<8x512xf32>
    %91 = vector.extract_strided_slice %90 {offsets = [0, 0], sizes = [8, 384], strides = [1, 1]} : vector<8x512xf32> to vector<8x384xf32>
    %92 = arith.negf %91 : vector<8x384xf32>
    %93 = math.exp %92 : vector<8x384xf32>
    %cst_20 = arith.constant 1.000000e+00 : f32
    %94 = vector.broadcast %cst_20 : f32 to vector<8x384xf32>
    %95 = arith.addf %94, %93 : vector<8x384xf32>
    %96 = arith.divf %94, %95 : vector<8x384xf32>
    %97 = vector.extract_strided_slice %90 {offsets = [0, 384], sizes = [8, 128], strides = [1, 1]} : vector<8x512xf32> to vector<8x128xf32>
    %98 = math.tanh %97 : vector<8x128xf32>
    %99 = vector.extract_strided_slice %96 {offsets = [0, 0], sizes = [8, 128], strides = [1, 1]} : vector<8x384xf32> to vector<8x128xf32>
    %100 = vector.extract_strided_slice %96 {offsets = [0, 128], sizes = [8, 128], strides = [1, 1]} : vector<8x384xf32> to vector<8x128xf32>
    %101 = vector.extract_strided_slice %96 {offsets = [0, 256], sizes = [8, 128], strides = [1, 1]} : vector<8x384xf32> to vector<8x128xf32>
    %102 = arith.mulf %100, %83 : vector<8x128xf32>
    %103 = arith.mulf %99, %98 : vector<8x128xf32>
    %104 = arith.addf %102, %103 : vector<8x128xf32>
    %105 = math.tanh %104 : vector<8x128xf32>
    %106 = arith.mulf %101, %105 : vector<8x128xf32>
    %c5_i32 = arith.constant 5 : i32
    %cst_21 = arith.constant dense<0.000000e+00> : vector<8x512xf32>
    %107 = tpu.matmul %106, %0, %cst_21 {dimension_numbers = #tpu.dot_dimension_numbers<[1], [0], [0], [1], [0, 0, 1, 1], [], []>} : vector<8x128xf32>, vector<128x512xf32>, vector<8x512xf32> -> vector<8x512xf32>
    %108 = arith.index_cast %c5_i32 : i32 to index
    %c0_22 = arith.constant 0 : index
    %c0_23 = arith.constant 0 : index
    %109 = vector.load %arg1[%108, %c0_22, %c0_23] : memref<9x8x512xf32, #tpu.memory_space<vmem>>, vector<1x8x512xf32>
    %110 = vector.shape_cast %109 : vector<1x8x512xf32> to vector<8x512xf32>
    %111 = arith.addf %107, %110 : vector<8x512xf32>
    %112 = vector.extract_strided_slice %111 {offsets = [0, 0], sizes = [8, 384], strides = [1, 1]} : vector<8x512xf32> to vector<8x384xf32>
    %113 = arith.negf %112 : vector<8x384xf32>
    %114 = math.exp %113 : vector<8x384xf32>
    %cst_24 = arith.constant 1.000000e+00 : f32
    %115 = vector.broadcast %cst_24 : f32 to vector<8x384xf32>
    %116 = arith.addf %115, %114 : vector<8x384xf32>
    %117 = arith.divf %115, %116 : vector<8x384xf32>
    %118 = vector.extract_strided_slice %111 {offsets = [0, 384], sizes = [8, 128], strides = [1, 1]} : vector<8x512xf32> to vector<8x128xf32>
    %119 = math.tanh %118 : vector<8x128xf32>
    %120 = vector.extract_strided_slice %117 {offsets = [0, 0], sizes = [8, 128], strides = [1, 1]} : vector<8x384xf32> to vector<8x128xf32>
    %121 = vector.extract_strided_slice %117 {offsets = [0, 128], sizes = [8, 128], strides = [1, 1]} : vector<8x384xf32> to vector<8x128xf32>
    %122 = vector.extract_strided_slice %117 {offsets = [0, 256], sizes = [8, 128], strides = [1, 1]} : vector<8x384xf32> to vector<8x128xf32>
    %123 = arith.mulf %121, %104 : vector<8x128xf32>
    %124 = arith.mulf %120, %119 : vector<8x128xf32>
    %125 = arith.addf %123, %124 : vector<8x128xf32>
    %126 = math.tanh %125 : vector<8x128xf32>
    %127 = arith.mulf %122, %126 : vector<8x128xf32>
    %c6_i32 = arith.constant 6 : i32
    %cst_25 = arith.constant dense<0.000000e+00> : vector<8x512xf32>
    %128 = tpu.matmul %127, %0, %cst_25 {dimension_numbers = #tpu.dot_dimension_numbers<[1], [0], [0], [1], [0, 0, 1, 1], [], []>} : vector<8x128xf32>, vector<128x512xf32>, vector<8x512xf32> -> vector<8x512xf32>
    %129 = arith.index_cast %c6_i32 : i32 to index
    %c0_26 = arith.constant 0 : index
    %c0_27 = arith.constant 0 : index
    %130 = vector.load %arg1[%129, %c0_26, %c0_27] : memref<9x8x512xf32, #tpu.memory_space<vmem>>, vector<1x8x512xf32>
    %131 = vector.shape_cast %130 : vector<1x8x512xf32> to vector<8x512xf32>
    %132 = arith.addf %128, %131 : vector<8x512xf32>
    %133 = vector.extract_strided_slice %132 {offsets = [0, 0], sizes = [8, 384], strides = [1, 1]} : vector<8x512xf32> to vector<8x384xf32>
    %134 = arith.negf %133 : vector<8x384xf32>
    %135 = math.exp %134 : vector<8x384xf32>
    %cst_28 = arith.constant 1.000000e+00 : f32
    %136 = vector.broadcast %cst_28 : f32 to vector<8x384xf32>
    %137 = arith.addf %136, %135 : vector<8x384xf32>
    %138 = arith.divf %136, %137 : vector<8x384xf32>
    %139 = vector.extract_strided_slice %132 {offsets = [0, 384], sizes = [8, 128], strides = [1, 1]} : vector<8x512xf32> to vector<8x128xf32>
    %140 = math.tanh %139 : vector<8x128xf32>
    %141 = vector.extract_strided_slice %138 {offsets = [0, 0], sizes = [8, 128], strides = [1, 1]} : vector<8x384xf32> to vector<8x128xf32>
    %142 = vector.extract_strided_slice %138 {offsets = [0, 128], sizes = [8, 128], strides = [1, 1]} : vector<8x384xf32> to vector<8x128xf32>
    %143 = vector.extract_strided_slice %138 {offsets = [0, 256], sizes = [8, 128], strides = [1, 1]} : vector<8x384xf32> to vector<8x128xf32>
    %144 = arith.mulf %142, %125 : vector<8x128xf32>
    %145 = arith.mulf %141, %140 : vector<8x128xf32>
    %146 = arith.addf %144, %145 : vector<8x128xf32>
    %147 = math.tanh %146 : vector<8x128xf32>
    %148 = arith.mulf %143, %147 : vector<8x128xf32>
    %c7_i32 = arith.constant 7 : i32
    %cst_29 = arith.constant dense<0.000000e+00> : vector<8x512xf32>
    %149 = tpu.matmul %148, %0, %cst_29 {dimension_numbers = #tpu.dot_dimension_numbers<[1], [0], [0], [1], [0, 0, 1, 1], [], []>} : vector<8x128xf32>, vector<128x512xf32>, vector<8x512xf32> -> vector<8x512xf32>
    %150 = arith.index_cast %c7_i32 : i32 to index
    %c0_30 = arith.constant 0 : index
    %c0_31 = arith.constant 0 : index
    %151 = vector.load %arg1[%150, %c0_30, %c0_31] : memref<9x8x512xf32, #tpu.memory_space<vmem>>, vector<1x8x512xf32>
    %152 = vector.shape_cast %151 : vector<1x8x512xf32> to vector<8x512xf32>
    %153 = arith.addf %149, %152 : vector<8x512xf32>
    %154 = vector.extract_strided_slice %153 {offsets = [0, 0], sizes = [8, 384], strides = [1, 1]} : vector<8x512xf32> to vector<8x384xf32>
    %155 = arith.negf %154 : vector<8x384xf32>
    %156 = math.exp %155 : vector<8x384xf32>
    %cst_32 = arith.constant 1.000000e+00 : f32
    %157 = vector.broadcast %cst_32 : f32 to vector<8x384xf32>
    %158 = arith.addf %157, %156 : vector<8x384xf32>
    %159 = arith.divf %157, %158 : vector<8x384xf32>
    %160 = vector.extract_strided_slice %153 {offsets = [0, 384], sizes = [8, 128], strides = [1, 1]} : vector<8x512xf32> to vector<8x128xf32>
    %161 = math.tanh %160 : vector<8x128xf32>
    %162 = vector.extract_strided_slice %159 {offsets = [0, 0], sizes = [8, 128], strides = [1, 1]} : vector<8x384xf32> to vector<8x128xf32>
    %163 = vector.extract_strided_slice %159 {offsets = [0, 128], sizes = [8, 128], strides = [1, 1]} : vector<8x384xf32> to vector<8x128xf32>
    %164 = vector.extract_strided_slice %159 {offsets = [0, 256], sizes = [8, 128], strides = [1, 1]} : vector<8x384xf32> to vector<8x128xf32>
    %165 = arith.mulf %163, %146 : vector<8x128xf32>
    %166 = arith.mulf %162, %161 : vector<8x128xf32>
    %167 = arith.addf %165, %166 : vector<8x128xf32>
    %168 = math.tanh %167 : vector<8x128xf32>
    %169 = arith.mulf %164, %168 : vector<8x128xf32>
    %c8_i32 = arith.constant 8 : i32
    %cst_33 = arith.constant dense<0.000000e+00> : vector<8x512xf32>
    %170 = tpu.matmul %169, %0, %cst_33 {dimension_numbers = #tpu.dot_dimension_numbers<[1], [0], [0], [1], [0, 0, 1, 1], [], []>} : vector<8x128xf32>, vector<128x512xf32>, vector<8x512xf32> -> vector<8x512xf32>
    %171 = arith.index_cast %c8_i32 : i32 to index
    %c0_34 = arith.constant 0 : index
    %c0_35 = arith.constant 0 : index
    %172 = vector.load %arg1[%171, %c0_34, %c0_35] : memref<9x8x512xf32, #tpu.memory_space<vmem>>, vector<1x8x512xf32>
    %173 = vector.shape_cast %172 : vector<1x8x512xf32> to vector<8x512xf32>
    %174 = arith.addf %170, %173 : vector<8x512xf32>
    %175 = vector.extract_strided_slice %174 {offsets = [0, 0], sizes = [8, 384], strides = [1, 1]} : vector<8x512xf32> to vector<8x384xf32>
    %176 = arith.negf %175 : vector<8x384xf32>
    %177 = math.exp %176 : vector<8x384xf32>
    %cst_36 = arith.constant 1.000000e+00 : f32
    %178 = vector.broadcast %cst_36 : f32 to vector<8x384xf32>
    %179 = arith.addf %178, %177 : vector<8x384xf32>
    %180 = arith.divf %178, %179 : vector<8x384xf32>
    %181 = vector.extract_strided_slice %174 {offsets = [0, 384], sizes = [8, 128], strides = [1, 1]} : vector<8x512xf32> to vector<8x128xf32>
    %182 = math.tanh %181 : vector<8x128xf32>
    %183 = vector.extract_strided_slice %180 {offsets = [0, 0], sizes = [8, 128], strides = [1, 1]} : vector<8x384xf32> to vector<8x128xf32>
    %184 = vector.extract_strided_slice %180 {offsets = [0, 128], sizes = [8, 128], strides = [1, 1]} : vector<8x384xf32> to vector<8x128xf32>
    %185 = vector.extract_strided_slice %180 {offsets = [0, 256], sizes = [8, 128], strides = [1, 1]} : vector<8x384xf32> to vector<8x128xf32>
    %186 = arith.mulf %184, %167 : vector<8x128xf32>
    %187 = arith.mulf %183, %182 : vector<8x128xf32>
    %188 = arith.addf %186, %187 : vector<8x128xf32>
    %189 = math.tanh %188 : vector<8x128xf32>
    %190 = arith.mulf %185, %189 : vector<8x128xf32>
    %c9_i32 = arith.constant 9 : i32
    %191 = vector.extract_strided_slice %190 {offsets = [0, 64], sizes = [8, 64], strides = [1, 1]} : vector<8x128xf32> to vector<8x64xf32>
    %c0_37 = arith.constant 0 : index
    %c0_38 = arith.constant 0 : index
    %192 = vector.load %arg3[%c0_37, %c0_38] : memref<64x32xf32, #tpu.memory_space<vmem>>, vector<64x32xf32>
    %cst_39 = arith.constant dense<0.000000e+00> : vector<8x32xf32>
    %193 = tpu.matmul %191, %192, %cst_39 {dimension_numbers = #tpu.dot_dimension_numbers<[1], [0], [0], [1], [0, 0, 1, 1], [], []>} : vector<8x64xf32>, vector<64x32xf32>, vector<8x32xf32> -> vector<8x32xf32>
    %c0_40 = arith.constant 0 : index
    %c0_41 = arith.constant 0 : index
    %194 = vector.load %arg4[%c0_40, %c0_41] : memref<1x32xf32, #tpu.memory_space<vmem>>, vector<1x32xf32>
    %195 = vector.broadcast %194 : vector<1x32xf32> to vector<8x32xf32>
    %196 = arith.addf %193, %195 : vector<8x32xf32>
    %cst_42 = arith.constant 0.000000e+00 : f32
    %197 = vector.broadcast %cst_42 : f32 to vector<8x32xf32>
    %198 = arith.maximumf %196, %197 : vector<8x32xf32>
    %c0_43 = arith.constant 0 : index
    %c0_44 = arith.constant 0 : index
    %199 = vector.load %arg5[%c0_43, %c0_44] : memref<1x32xf32, #tpu.memory_space<vmem>>, vector<1x32xf32>
    %200 = vector.broadcast %199 : vector<1x32xf32> to vector<8x32xf32>
    %201 = arith.mulf %198, %200 : vector<8x32xf32>
    %cst_45 = arith.constant dense<0.000000e+00> : vector<8xf32>
    %202 = vector.multi_reduction <add>, %201, %cst_45 [1] : vector<8x32xf32> to vector<8xf32>
    %203 = vector.shape_cast %202 : vector<8xf32> to vector<8x1xf32>
    %c0_46 = arith.constant 0 : index
    %c0_47 = arith.constant 0 : index
    %204 = vector.load %arg6[%c0_46, %c0_47] : memref<1x1xf32, #tpu.memory_space<vmem>>, vector<1x1xf32>
    %205 = vector.broadcast %204 : vector<1x1xf32> to vector<8x1xf32>
    %206 = arith.addf %203, %205 : vector<8x1xf32>
    %c0_48 = arith.constant 0 : index
    %c0_49 = arith.constant 0 : index
    %207 = vector.load %arg7[%c0_48, %c0_49] : memref<8x1xf32, #tpu.memory_space<vmem>>, vector<8x1xf32>
    tpu.vector_store %arg7[%c0_48, %c0_49], %206 {strides = array<i32>} : memref<8x1xf32, #tpu.memory_space<vmem>>, vector<8x1xf32>,
    return
  }
  func.func @transform_0(%arg0: i32) -> (i32, i32, i32) {
    %c0_i32 = arith.constant 0 : i32
    %c0_i32_0 = arith.constant 0 : i32
    %c0_i32_1 = arith.constant 0 : i32
    return %c0_i32, %arg0, %c0_i32_0 : i32, i32, i32
  }
  func.func @transform_1(%arg0: i32) -> (i32, i32) {
    %c0_i32 = arith.constant 0 : i32
    %c0_i32_0 = arith.constant 0 : i32
    %c0_i32_1 = arith.constant 0 : i32
    return %c0_i32, %c0_i32_0 : i32, i32
  }
  func.func @transform_2(%arg0: i32) -> (i32, i32) {
    %c0_i32 = arith.constant 0 : i32
    %c0_i32_0 = arith.constant 0 : i32
    %c0_i32_1 = arith.constant 0 : i32
    return %c0_i32, %c0_i32_0 : i32, i32
  }
  func.func @transform_3(%arg0: i32) -> (i32, i32) {
    %c0_i32 = arith.constant 0 : i32
    %c0_i32_0 = arith.constant 0 : i32
    %c0_i32_1 = arith.constant 0 : i32
    return %c0_i32, %c0_i32_0 : i32, i32
  }
  func.func @transform_4(%arg0: i32) -> (i32, i32) {
    %c0_i32 = arith.constant 0 : i32
    %c0_i32_0 = arith.constant 0 : i32
    %c0_i32_1 = arith.constant 0 : i32
    return %c0_i32, %c0_i32_0 : i32, i32
  }
  func.func @transform_5(%arg0: i32) -> (i32, i32) {
    %c0_i32 = arith.constant 0 : i32
    %c0_i32_0 = arith.constant 0 : i32
    %c0_i32_1 = arith.constant 0 : i32
    return %c0_i32, %c0_i32_0 : i32, i32
  }
  func.func @transform_6(%arg0: i32) -> (i32, i32) {
    %c0_i32 = arith.constant 0 : i32
    %c0_i32_0 = arith.constant 0 : i32
    return %arg0, %c0_i32 : i32, i32
  }
}

</mosaic_0001>

<bundles_post_ra>
// kernel: lstm_model_forward.1
= control target key start
LH: loop header
LB: loop body
LE: loop exit
PB: predicated region body
PF: predicated region fallthrough
CT: control target
= control target key end

     0   :  { %v2572_v3 = vmov 0.0   ;;  %vm2574_vm0 = vmmov 0   ;;  %vm1645_vm1 = vcmask 523264   ;;  %vm1727_vm2 = vcmask 261120   ;;  %s3352_s1 = inlined_call_operand.vmem [shape: f32[128,512], index: 1, kind: input, shape index: {}]   ;;  %s3353_s0 = inlined_call_operand.vmem [shape: f32[9,8,512], index: 0, kind: input, shape index: {}]   ;;  %s3354_s2 = inlined_call_operand.vmem [shape: f32[64,32], index: 2, kind: input, shape index: {}]   ;;  %s3355_s5 = inlined_call_operand.<no memory space> [shape: f32[1,1], index: 5, kind: input, shape index: {}]   ;;  %s3356_s3 = inlined_call_operand.vmem [shape: f32[1,32], index: 3, kind: input, shape index: {}]   ;;  %s3357_s4 = inlined_call_operand.vmem [shape: f32[1,32], index: 4, kind: input, shape index: {}]   ;;  %s3358_s6 = inlined_call_operand.vmem [shape: f32[8,1], index: 6, kind: output, shape index: {}]  }
   0x1   :  { %v26_v0 = vld [vmem:[%s3352_s1 + $0x8] sm:$0xff]  ;;  %v25_v2 = vld [vmem:[%s3352_s1] sm:$0xff]  ;;  %157 = vmatprep.mubr.f32.mxu0 %v2572_v3  ;;  %228 = vmatprep.mubr.f32.mxu1 %v2572_v3  ;;  %v28_v19 = vld [vmem:[%s3352_s1 + $0x18] sm:$0xff]  ;;  %vm1739_vm3 = vcmask 7168  }
   0x2   :  { %v30_v1 = vld [vmem:[%s3352_s1 + $0x28] sm:$0xff]  ;;  %v29_v5 = vld [vmem:[%s3352_s1 + $0x20] sm:$0xff]  ;;  %v32_v20 = vld [vmem:[%s3352_s1 + $0x38] sm:$0xff] }
   0x3   :  { %v2622_v4 = vpack.c.bf16 %v30_v1, %v26_v0  ;;  %v34_v6 = vld [vmem:[%s3352_s1 + $0x48] sm:$0xff]  ;;  %v2633_v8 = vpack.c.bf16 %v29_v5, %v25_v2  ;;  %v33_v10 = vld [vmem:[%s3352_s1 + $0x40] sm:$0xff]  ;;  %v2674_v22 = vpack.c.bf16 %v32_v20, %v28_v19  ;;  %v27_v23 = vld [vmem:[%s3352_s1 + $0x10] sm:$0xff] }
   0x4   :  { %v38_v7 = vld [vmem:[%s3352_s1 + $0x68] sm:$0xff]  ;;  %v37_v11 = vld [vmem:[%s3352_s1 + $0x60] sm:$0xff]  ;;  %v31_v24 = vld [vmem:[%s3352_s1 + $0x30] sm:$0xff] }
   0x5   :  { %v2635_v9 = vpack.c.bf16 %v38_v7, %v34_v6  ;;  %v42_v12 = vld [vmem:[%s3352_s1 + $0x88] sm:$0xff]  ;;  %1837 = vmatprep.subr.bf16.mxu0 %v2622_v4  ;;  %v2651_v14 = vpack.c.bf16 %v37_v11, %v33_v10  ;;  %v41_v15 = vld [vmem:[%s3352_s1 + $0x80] sm:$0xff]  ;;  %v2682_v25 = vpack.c.bf16 %v31_v24, %v27_v23  ;;  %1869 = vmatprep.subr.bf16.mxu1 %v2674_v22  ;;  %v36_v27 = vld [vmem:[%s3352_s1 + $0x58] sm:$0xff] }
   0x6   :  { %v46_v13 = vld [vmem:[%s3352_s1 + $0xa8] sm:$0xff]  ;;  %1839 = vmatpush1.bf16.msra.mxu0 %v2633_v8  ;;  %v45_v16 = vld [vmem:[%s3352_s1 + $0xa0] sm:$0xff]  ;;  %v40_v28 = vld [vmem:[%s3352_s1 + $0x78] sm:$0xff] }
   0x7   :  { %1841 = vmatprep.subr.bf16.mxu0 %v2635_v9  ;;  %v2660_v17 = vpack.c.bf16 %v46_v13, %v42_v12  ;;  %v50_v18 = vld [vmem:[%s3352_s1 + $0xc8] sm:$0xff]  ;;  %v2685_v26 = vpack.c.bf16 %v45_v16, %v41_v15  ;;  %v35_v29 = vld [vmem:[%s3352_s1 + $0x50] sm:$0xff]  ;;  %v49_v31 = vld [vmem:[%s3352_s1 + $0xc0] sm:$0xff]  ;;  %1871 = vmatpush1.bf16.msra.mxu1 %v2682_v25  ;;  %v2707_v33 = vpack.c.bf16 %v40_v28, %v36_v27 }
   0x8   :  { %v54_v21 = vld [vmem:[%s3352_s1 + $0xe8] sm:$0xff]  ;;  %v53_v32 = vld [vmem:[%s3352_s1 + $0xe0] sm:$0xff]  ;;  %v39_v34 = vld [vmem:[%s3352_s1 + $0x70] sm:$0xff] }
   0x9   :  { %v2698_v30 = vpack.c.bf16 %v54_v21, %v50_v18  ;;  %v58_v35 = vld [vmem:[%s3352_s1 + $0x108] sm:$0xff]  ;;  %v2718_v37 = vpack.c.bf16 %v39_v34, %v35_v29  ;;  %v44_v38 = vld [vmem:[%s3352_s1 + $0x98] sm:$0xff]  ;;  %1873 = vmatprep.subr.bf16.mxu1 %v2707_v33  ;;  %v43_v40 = vld [vmem:[%s3352_s1 + $0x90] sm:$0xff]  ;;  %v2734_v42 = vpack.c.bf16 %v53_v32, %v49_v31 }
   0xa   :  { %1843 = vmatpush1.bf16.msra.mxu0 %v2651_v14  ;;  %v62_v36 = vld [vmem:[%s3352_s1 + $0x128] sm:$0xff]  ;;  %v48_v39 = vld [vmem:[%s3352_s1 + $0xb8] sm:$0xff]  ;;  %v47_v41 = vld [vmem:[%s3352_s1 + $0xb0] sm:$0xff] }
   0xb   :  { %1845 = vmatprep.subr.bf16.mxu0 %v2660_v17  ;;  %v57_v43 = vld [vmem:[%s3352_s1 + $0x100] sm:$0xff]  ;;  %v2742_v45 = vpack.c.bf16 %v48_v39, %v44_v38  ;;  %v2745_v46 = vpack.c.bf16 %v62_v36, %v58_v35  ;;  %1875 = vmatpush1.bf16.msra.mxu1 %v2718_v37  ;;  %v66_v47 = vld [vmem:[%s3352_s1 + $0x148] sm:$0xff]  ;;  %v2751_v48 = vpack.c.bf16 %v47_v41, %v43_v40  ;;  %v52_v49 = vld [vmem:[%s3352_s1 + $0xd8] sm:$0xff] }
   0xc   :  { %v61_v44 = vld [vmem:[%s3352_s1 + $0x120] sm:$0xff]  ;;  %v56_v50 = vld [vmem:[%s3352_s1 + $0xf8] sm:$0xff]  ;;  %v70_v51 = vld [vmem:[%s3352_s1 + $0x168] sm:$0xff] }
   0xd   :  { %1877 = vmatprep.subr.bf16.mxu1 %v2742_v45  ;;  %v2763_v52 = vpack.c.bf16 %v56_v50, %v52_v49  ;;  %v51_v53 = vld [vmem:[%s3352_s1 + $0xd0] sm:$0xff]  ;;  %v2772_v55 = vpack.c.bf16 %v61_v44, %v57_v43  ;;  %v60_v56 = vld [vmem:[%s3352_s1 + $0x118] sm:$0xff]  ;;  %v2781_v58 = vpack.c.bf16 %v70_v51, %v66_v47  ;;  %v65_v59 = vld [vmem:[%s3352_s1 + $0x140] sm:$0xff] }
   0xe   :  { %1847 = vmatpush1.bf16.msra.mxu0 %v2685_v26  ;;  %v55_v54 = vld [vmem:[%s3352_s1 + $0xf0] sm:$0xff]  ;;  %v64_v57 = vld [vmem:[%s3352_s1 + $0x138] sm:$0xff]  ;;  %v69_v60 = vld [vmem:[%s3352_s1 + $0x160] sm:$0xff] }
   0xf   :  { %1849 = vmatprep.subr.bf16.mxu0 %v2698_v30  ;;  %1879 = vmatpush1.bf16.msra.mxu1 %v2751_v48  ;;  %v74_v61 = vld [vmem:[%s3352_s1 + $0x188] sm:$0xff]  ;;  %v2793_v62 = vpack.c.bf16 %v55_v54, %v51_v53  ;;  %v2799_v0 = vpack.c.bf16 %v64_v57, %v60_v56  ;;  %v59_v1 = vld [vmem:[%s3352_s1 + $0x110] sm:$0xff]  ;;  %v68_v5 = vld [vmem:[%s3352_s1 + $0x158] sm:$0xff]  ;;  %v2814_v7 = vpack.c.bf16 %v69_v60, %v65_v59 }
  0x10   :  { %v78_v63 = vld [vmem:[%s3352_s1 + $0x1a8] sm:$0xff]  ;;  %1881 = vmatprep.subr.bf16.mxu1 %v2763_v52  ;;  %v63_v2 = vld [vmem:[%s3352_s1 + $0x130] sm:$0xff]  ;;  %v72_v6 = vld [vmem:[%s3352_s1 + $0x178] sm:$0xff] }
  0x11   :  { %v2817_v10 = vpack.c.bf16 %v78_v63, %v74_v61  ;;  %v73_v11 = vld [vmem:[%s3352_s1 + $0x180] sm:$0xff]  ;;  %v82_v13 = vld [vmem:[%s3352_s1 + $0x1c8] sm:$0xff]  ;;  %v2829_v15 = vpack.c.bf16 %v63_v2, %v59_v1  ;;  %v2835_v18 = vpack.c.bf16 %v72_v6, %v68_v5  ;;  %v67_v19 = vld [vmem:[%s3352_s1 + $0x150] sm:$0xff] }
  0x12   :  { %1851 = vmatpush1.bf16.msra.mxu0 %v2734_v42  ;;  %v77_v12 = vld [vmem:[%s3352_s1 + $0x1a0] sm:$0xff]  ;;  %v86_v16 = vld [vmem:[%s3352_s1 + $0x1e8] sm:$0xff]  ;;  %v71_v20 = vld [vmem:[%s3352_s1 + $0x170] sm:$0xff] }
  0x13   :  { %1853 = vmatprep.subr.bf16.mxu0 %v2745_v46  ;;  %1883 = vmatpush1.bf16.msra.mxu1 %v2793_v62  ;;  %v76_v21 = vld [vmem:[%s3352_s1 + $0x198] sm:$0xff]  ;;  %v2850_v24 = vpack.c.bf16 %v77_v12, %v73_v11  ;;  %v2853_v27 = vpack.c.bf16 %v86_v16, %v82_v13  ;;  %v81_v28 = vld [vmem:[%s3352_s1 + $0x1c0] sm:$0xff]  ;;  %v2862_v31 = vpack.c.bf16 %v71_v20, %v67_v19  ;;  %v75_v34 = vld [vmem:[%s3352_s1 + $0x190] sm:$0xff] }
  0x14   :  { %1885 = vmatprep.subr.bf16.mxu1 %v2799_v0  ;;  %v80_v23 = vld [vmem:[%s3352_s1 + $0x1b8] sm:$0xff]  ;;  %v85_v29 = vld [vmem:[%s3352_s1 + $0x1e0] sm:$0xff]  ;;  %v79_v35 = vld [vmem:[%s3352_s1 + $0x1b0] sm:$0xff] }
  0x15   :  { %v2865_v32 = vpack.c.bf16 %v80_v23, %v76_v21  ;;  %v84_v36 = vld [vmem:[%s3352_s1 + $0x1d8] sm:$0xff]  ;;  %v2880_v39 = vpack.c.bf16 %v85_v29, %v81_v28  ;;  %v2884_v40 = vpack.c.bf16 %v79_v35, %v75_v34  ;;  %v83_v43 = vld [vmem:[%s3352_s1 + $0x1d0] sm:$0xff]  ;;  %v89_v49 = vld [vmem:[%s3353_s0] sm:$0xff] }
  0x16   :  { %1855 = vmatpush1.bf16.msra.mxu0 %v2772_v55  ;;  %v88_v38 = vld [vmem:[%s3352_s1 + $0x1f8] sm:$0xff]  ;;  %v87_v44 = vld [vmem:[%s3352_s1 + $0x1f0] sm:$0xff]  ;;  %v90_v50 = vld [vmem:[%s3353_s0 + $0x8] sm:$0xff] }
  0x17   :  { %1857 = vmatprep.subr.bf16.mxu0 %v2781_v58  ;;  %1887 = vmatpush1.bf16.msra.mxu1 %v2829_v15  ;;  %v2887_v41 = vpack.c.bf16 %v88_v38, %v84_v36  ;;  %v2897_v47 = vpack.c.bf16 %v87_v44, %v83_v43  ;;  %v91_v60 = vld [vmem:[%s3353_s0 + $0x10] sm:$0xff]  ;;  %v92_v2 = vld [vmem:[%s3353_s0 + $0x18] sm:$0xff]  ;;  %v1748_v44 = vld [vmem:[%s3353_s0 + $0x20] sm:$0xff] }
  0x18   :  { %1889 = vmatprep.subr.bf16.mxu1 %v2835_v18 }
  0x1a   :  { %1859 = vmatpush1.bf16.msra.mxu0 %v2814_v7 }
  0x1b   :  { %1861 = vmatprep.subr.bf16.mxu0 %v2817_v10  ;;  %1891 = vmatpush1.bf16.msra.mxu1 %v2862_v31 }
  0x1c   :  { %1893 = vmatprep.subr.bf16.mxu1 %v2865_v32 }
  0x1e   :  { %1863 = vmatpush1.bf16.msra.mxu0 %v2850_v24 }
  0x1f   :  { %1865 = vmatprep.subr.bf16.mxu0 %v2853_v27  ;;  %1895 = vmatpush1.bf16.msra.mxu1 %v2884_v40 }
  0x20   :  { %1897 = vmatprep.subr.bf16.mxu1 %v2887_v41 }
  0x22   :  { %1867 = vmatpush1.bf16.msra.mxu0 %v2880_v39 }
  0x23   :  { %1901 = vmatprep.subr.bf16.mxu0 %v2622_v4  ;;  %1899 = vmatpush1.bf16.msra.mxu1 %v2897_v47 }
  0x24   :  { %1933 = vmatprep.subr.bf16.mxu1 %v2674_v22 }
  0x25   :  { %158 = vmatmul.mubr.f32.vlgmr.msra.gmra.mrb[0].mxu0 %v2572_v3 }
  0x26   :  { %1903 = vmatpush1.bf16.msra.mxu0 %v2633_v8  ;;  %328 = vmatprep.mubr.f32.mxu0 %v2572_v3 }
  0x27   :  { %1905 = vmatprep.subr.bf16.mxu0 %v2635_v9  ;;  %229 = vmatmul.mubr.f32.vlgmr.msra.gmra.mrb[0].mxu1 %v2572_v3 }
  0x28   :  { %1935 = vmatpush1.bf16.msra.mxu1 %v2682_v25  ;;  %399 = vmatprep.mubr.f32.mxu1 %v2572_v3 }
  0x29   :  { %1937 = vmatprep.subr.bf16.mxu1 %v2707_v33 }
  0x2a   :  { %1907 = vmatpush1.bf16.msra.mxu0 %v2651_v14 }
  0x2b   :  { %1909 = vmatprep.subr.bf16.mxu0 %v2660_v17 }
  0x2c   :  { %1939 = vmatpush1.bf16.msra.mxu1 %v2718_v37 }
  0x2d   :  { %1941 = vmatprep.subr.bf16.mxu1 %v2742_v45 }
  0x2e   :  { %1911 = vmatpush1.bf16.msra.mxu0 %v2685_v26 }
  0x2f   :  { %1913 = vmatprep.subr.bf16.mxu0 %v2698_v30 }
  0x30   :  { %1943 = vmatpush1.bf16.msra.mxu1 %v2751_v48 }
  0x31   :  { %1945 = vmatprep.subr.bf16.mxu1 %v2763_v52 }
  0x32   :  { %1915 = vmatpush1.bf16.msra.mxu0 %v2734_v42 }
  0x33   :  { %1917 = vmatprep.subr.bf16.mxu0 %v2745_v46 }
  0x34   :  { %1947 = vmatpush1.bf16.msra.mxu1 %v2793_v62 }
  0x35   :  { %1949 = vmatprep.subr.bf16.mxu1 %v2799_v0 }
  0x36   :  { %1919 = vmatpush1.bf16.msra.mxu0 %v2772_v55 }
  0x37   :  { %1921 = vmatprep.subr.bf16.mxu0 %v2781_v58 }
  0x38   :  { %1951 = vmatpush1.bf16.msra.mxu1 %v2829_v15 }
  0x39   :  { %1953 = vmatprep.subr.bf16.mxu1 %v2835_v18 }
  0x3a   :  { %1923 = vmatpush1.bf16.msra.mxu0 %v2814_v7 }
  0x3b   :  { %1925 = vmatprep.subr.bf16.mxu0 %v2817_v10 }
  0x3c   :  { %1955 = vmatpush1.bf16.msra.mxu1 %v2862_v31 }
  0x3d   :  { %1957 = vmatprep.subr.bf16.mxu1 %v2865_v32 }
  0x3e   :  { %1927 = vmatpush1.bf16.msra.mxu0 %v2850_v24 }
  0x3f   :  { %1929 = vmatprep.subr.bf16.mxu0 %v2853_v27 }
  0x40   :  { %1959 = vmatpush1.bf16.msra.mxu1 %v2884_v40 }
  0x41   :  { %1961 = vmatprep.subr.bf16.mxu1 %v2887_v41 }
  0x42   :  { %1931 = vmatpush1.bf16.msra.mxu0 %v2880_v39 }
  0x43   :  { %1965 = vmatprep.subr.bf16.mxu0 %v2622_v4 }
  0x44   :  { %1963 = vmatpush1.bf16.msra.mxu1 %v2897_v47 }
  0x45   :  { %1997 = vmatprep.subr.bf16.mxu1 %v2674_v22 }
  0xf8   :  { %v159_v51 = vpop.f32.mrb[0].mxu0 }
  0xf9   :  { %v160_v53 = vadd.f32 %v159_v51, %v89_v49  ;;  %v161_v54 = vpop.f32.mrb[1].mxu0  ;;  %v1749_v49 = vld [vmem:[%s3353_s0 + $0x28] sm:$0xff] }
  0xfa   :  { %v162_v56 = vadd.f32 %v161_v54, %v90_v50  ;;  %v230_v61 = vpop.f32.mrb[0].mxu1 }
  0xfb   :  { %v1745_v57 = vmul.f32 -1.442695, %v160_v53  ;;  %v232_v63 = vpop.f32.mrb[1].mxu1  ;;  %v231_v1 = vadd.f32 %v230_v61, %v91_v60  ;;  %v1750_v61 = vld [vmem:[%s3353_s0 + $0x30] sm:$0xff] }
  0xfc   :  { %v1746_v59 = vmul.f32 -1.442695, %v162_v56  ;;  %v233_v6 = vadd.f32 %v232_v63, %v92_v2 }
  0xfd   :  { %2428 = vpow2.f32 %v1745_v57  ;;  %v1747_v5 = vmul.f32 -1.442695, %v231_v1  ;;  %v1751_v1 = vld [vmem:[%s3353_s0 + $0x38] sm:$0xff] }
  0xfe   :  { %2430 = vpow2.f32 %v1746_v59 }
  0xff   :  { %2432 = vpow2.f32 %v1747_v5 }
 0x100   :  { %2434 = vtanh.f32 %v233_v6 }
 0x107   :  { %v2429_v11 = vpop.eup %2428 }
 0x108   :  { %v2431_v12 = vpop.eup %2430  ;;  %v244_v13 = vadd.f32 1.0, %v2429_v11 }
 0x109   :  { %v245_v16 = vadd.f32 1.0, %v2431_v12  ;;  %v2433_v19 = vpop.eup %2432 }
 0x10a   :  { %2436 = vrcp.f32 %v244_v13  ;;  %v2435_v20 = vpop.eup %2434  ;;  %v246_v23 = vadd.f32 1.0, %v2433_v19 }
 0x10b   :  { %2438 = vrcp.f32 %v245_v16 }
 0x10c   :  { %2440 = vrcp.f32 %v246_v23 }
 0x114   :  { %v2437_v21 = vpop.eup %2436 }
 0x115   :  { %v2439_v28 = vpop.eup %2438  ;;  %v255_v29 = vmul.f32 %v2437_v21, %v2435_v20 }
 0x116   :  { %v254_v34 = vmul.f32 0.0, %v2439_v28  ;;  %v2441_v36 = vpop.eup %2440 }
 0x118   :  { %v2951_v35 = vadd.f32 %v255_v29, %v254_v34 }
 0x11a   :  { %2442 = vtanh.f32 %v2951_v35 }
 0x124   :  { %v2443_v38 = vpop.eup %2442 }
 0x125   :  { %v258_v43 = vmul.f32 %v2443_v38, %v2441_v36 }
 0x127   :  { %329 = vmatmul.mubr.f32.vlgmr.msra.gmra.mrb[2].mxu0 %v258_v43  ;;  %400 = vmatmul.mubr.f32.vlgmr.msra.gmra.mrb[2].mxu1 %v258_v43 }
 0x128   :  { %1967 = vmatpush1.bf16.msra.mxu0 %v2633_v8  ;;  %1999 = vmatpush1.bf16.msra.mxu1 %v2682_v25 }
 0x129   :  { %1969 = vmatprep.subr.bf16.mxu0 %v2635_v9  ;;  %2001 = vmatprep.subr.bf16.mxu1 %v2707_v33 }
 0x12a   :  { %499 = vmatprep.mubr.f32.mxu0 %v2572_v3  ;;  %570 = vmatprep.mubr.f32.mxu1 %v2572_v3 }
 0x12c   :  { %1971 = vmatpush1.bf16.msra.mxu0 %v2651_v14  ;;  %2003 = vmatpush1.bf16.msra.mxu1 %v2718_v37 }
 0x12d   :  { %1973 = vmatprep.subr.bf16.mxu0 %v2660_v17  ;;  %2005 = vmatprep.subr.bf16.mxu1 %v2742_v45 }
 0x130   :  { %1975 = vmatpush1.bf16.msra.mxu0 %v2685_v26  ;;  %2007 = vmatpush1.bf16.msra.mxu1 %v2751_v48 }
 0x131   :  { %1977 = vmatprep.subr.bf16.mxu0 %v2698_v30  ;;  %2009 = vmatprep.subr.bf16.mxu1 %v2763_v52 }
 0x134   :  { %1979 = vmatpush1.bf16.msra.mxu0 %v2734_v42  ;;  %2011 = vmatpush1.bf16.msra.mxu1 %v2793_v62 }
 0x135   :  { %1981 = vmatprep.subr.bf16.mxu0 %v2745_v46  ;;  %2013 = vmatprep.subr.bf16.mxu1 %v2799_v0 }
 0x138   :  { %1983 = vmatpush1.bf16.msra.mxu0 %v2772_v55  ;;  %2015 = vmatpush1.bf16.msra.mxu1 %v2829_v15 }
 0x139   :  { %1985 = vmatprep.subr.bf16.mxu0 %v2781_v58  ;;  %2017 = vmatprep.subr.bf16.mxu1 %v2835_v18 }
 0x13c   :  { %1987 = vmatpush1.bf16.msra.mxu0 %v2814_v7  ;;  %2019 = vmatpush1.bf16.msra.mxu1 %v2862_v31 }
 0x13d   :  { %1989 = vmatprep.subr.bf16.mxu0 %v2817_v10  ;;  %2021 = vmatprep.subr.bf16.mxu1 %v2865_v32 }
 0x140   :  { %1991 = vmatpush1.bf16.msra.mxu0 %v2850_v24  ;;  %2023 = vmatpush1.bf16.msra.mxu1 %v2884_v40 }
 0x141   :  { %1993 = vmatprep.subr.bf16.mxu0 %v2853_v27  ;;  %2025 = vmatprep.subr.bf16.mxu1 %v2887_v41 }
 0x144   :  { %1995 = vmatpush1.bf16.msra.mxu0 %v2880_v39  ;;  %2027 = vmatpush1.bf16.msra.mxu1 %v2897_v47 }
 0x145   :  { %2029 = vmatprep.subr.bf16.mxu0 %v2622_v4  ;;  %2061 = vmatprep.subr.bf16.mxu1 %v2674_v22 }
 0x1fa   :  { %v330_v50 = vpop.f32.mrb[2].mxu0  ;;  %v401_v51 = vpop.f32.mrb[2].mxu1 }
 0x1fb   :  { %v331_v53 = vadd.f32 %v1748_v44, %v330_v50  ;;  %v332_v54 = vpop.f32.mrb[3].mxu0  ;;  %v403_v56 = vpop.f32.mrb[3].mxu1  ;;  %v402_v63 = vadd.f32 %v1750_v61, %v401_v51  ;;  %v1756_v44 = vld [vmem:[%s3353_s0 + $0x48] sm:$0xff] }
 0x1fc   :  { %v333_v57 = vadd.f32 %v1749_v49, %v332_v54  ;;  %v404_v2 = vadd.f32 %v1751_v1, %v403_v56 }
 0x1fd   :  { %v1752_v59 = vmul.f32 -1.442695, %v331_v53  ;;  %v1754_v5 = vmul.f32 -1.442695, %v402_v63  ;;  %v1758_v63 = vld [vmem:[%s3353_s0 + $0x58] sm:$0xff] }
 0x1fe   :  { %v1753_v60 = vmul.f32 -1.442695, %v333_v57 }
 0x1ff   :  { %2444 = vpow2.f32 %v1752_v59 }
 0x200   :  { %2446 = vpow2.f32 %v1753_v60  ;;  %v1757_v60 = vld [vmem:[%s3353_s0 + $0x50] sm:$0xff] }
 0x201   :  { %2448 = vtanh.f32 %v404_v2 }
 0x202   :  { %2450 = vpow2.f32 %v1754_v5 }
 0x209   :  { %v2445_v6 = vpop.eup %2444 }
 0x20a   :  { %v415_v11 = vadd.f32 1.0, %v2445_v6  ;;  %v2447_v12 = vpop.eup %2446 }
 0x20b   :  { %v416_v13 = vadd.f32 1.0, %v2447_v12  ;;  %v2449_v16 = vpop.eup %2448 }
 0x20c   :  { %2452 = vrcp.f32 %v415_v11  ;;  %v2451_v19 = vpop.eup %2450 }
 0x20d   :  { %2454 = vrcp.f32 %v416_v13  ;;  %v417_v28 = vadd.f32 1.0, %v2451_v19 }
 0x20f   :  { %2456 = vrcp.f32 %v417_v28 }
 0x216   :  { %v2453_v20 = vpop.eup %2452 }
 0x217   :  { %v426_v21 = vmul.f32 %v2453_v20, %v2449_v16  ;;  %v2455_v23 = vpop.eup %2454 }
 0x218   :  { %v425_v29 = vmul.f32 %v2455_v23, %v2951_v35  ;;  %v1755_v35 = vld [vmem:[%s3353_s0 + $0x40] sm:$0xff] }
 0x219   :  { %v2457_v36 = vpop.eup %2456 }
 0x21a   :  { %v3001_v34 = vadd.f32 %v426_v21, %v425_v29 }
 0x21c   :  { %2458 = vtanh.f32 %v3001_v34 }
 0x226   :  { %v2459_v38 = vpop.eup %2458 }
 0x227   :  { %v429_v43 = vmul.f32 %v2459_v38, %v2457_v36 }
 0x229   :  { %500 = vmatmul.mubr.f32.vlgmr.msra.gmra.mrb[4].mxu0 %v429_v43  ;;  %571 = vmatmul.mubr.f32.vlgmr.msra.gmra.mrb[4].mxu1 %v429_v43 }
 0x22a   :  { %2031 = vmatpush1.bf16.msra.mxu0 %v2633_v8  ;;  %2063 = vmatpush1.bf16.msra.mxu1 %v2682_v25 }
 0x22b   :  { %2033 = vmatprep.subr.bf16.mxu0 %v2635_v9  ;;  %2065 = vmatprep.subr.bf16.mxu1 %v2707_v33 }
 0x22c   :  { %670 = vmatprep.mubr.f32.mxu0 %v2572_v3  ;;  %741 = vmatprep.mubr.f32.mxu1 %v2572_v3 }
 0x22e   :  { %2035 = vmatpush1.bf16.msra.mxu0 %v2651_v14  ;;  %2067 = vmatpush1.bf16.msra.mxu1 %v2718_v37 }
 0x22f   :  { %2037 = vmatprep.subr.bf16.mxu0 %v2660_v17  ;;  %2069 = vmatprep.subr.bf16.mxu1 %v2742_v45 }
 0x232   :  { %2039 = vmatpush1.bf16.msra.mxu0 %v2685_v26  ;;  %2071 = vmatpush1.bf16.msra.mxu1 %v2751_v48 }
 0x233   :  { %2041 = vmatprep.subr.bf16.mxu0 %v2698_v30  ;;  %2073 = vmatprep.subr.bf16.mxu1 %v2763_v52 }
 0x236   :  { %2043 = vmatpush1.bf16.msra.mxu0 %v2734_v42  ;;  %2075 = vmatpush1.bf16.msra.mxu1 %v2793_v62 }
 0x237   :  { %2045 = vmatprep.subr.bf16.mxu0 %v2745_v46  ;;  %2077 = vmatprep.subr.bf16.mxu1 %v2799_v0 }
 0x23a   :  { %2047 = vmatpush1.bf16.msra.mxu0 %v2772_v55  ;;  %2079 = vmatpush1.bf16.msra.mxu1 %v2829_v15 }
 0x23b   :  { %2049 = vmatprep.subr.bf16.mxu0 %v2781_v58  ;;  %2081 = vmatprep.subr.bf16.mxu1 %v2835_v18 }
 0x23e   :  { %2051 = vmatpush1.bf16.msra.mxu0 %v2814_v7  ;;  %2083 = vmatpush1.bf16.msra.mxu1 %v2862_v31 }
 0x23f   :  { %2053 = vmatprep.subr.bf16.mxu0 %v2817_v10  ;;  %2085 = vmatprep.subr.bf16.mxu1 %v2865_v32 }
 0x242   :  { %2055 = vmatpush1.bf16.msra.mxu0 %v2850_v24  ;;  %2087 = vmatpush1.bf16.msra.mxu1 %v2884_v40 }
 0x243   :  { %2057 = vmatprep.subr.bf16.mxu0 %v2853_v27  ;;  %2089 = vmatprep.subr.bf16.mxu1 %v2887_v41 }
 0x246   :  { %2059 = vmatpush1.bf16.msra.mxu0 %v2880_v39  ;;  %2091 = vmatpush1.bf16.msra.mxu1 %v2897_v47 }
 0x247   :  { %2093 = vmatprep.subr.bf16.mxu0 %v2622_v4  ;;  %2125 = vmatprep.subr.bf16.mxu1 %v2674_v22 }
 0x2fc   :  { %v501_v49 = vpop.f32.mrb[4].mxu0  ;;  %v572_v50 = vpop.f32.mrb[4].mxu1 }
 0x2fd   :  { %v502_v51 = vadd.f32 %v1755_v35, %v501_v49  ;;  %v503_v53 = vpop.f32.mrb[5].mxu0  ;;  %v574_v54 = vpop.f32.mrb[5].mxu1  ;;  %v573_v61 = vadd.f32 %v1757_v60, %v572_v50  ;;  %v1763_v35 = vld [vmem:[%s3353_s0 + $0x68] sm:$0xff] }
 0x2fe   :  { %v504_v56 = vadd.f32 %v1756_v44, %v503_v53  ;;  %v575_v1 = vadd.f32 %v1758_v63, %v574_v54 }
 0x2ff   :  { %v1759_v57 = vmul.f32 -1.442695, %v502_v51  ;;  %v1761_v2 = vmul.f32 -1.442695, %v573_v61  ;;  %v1765_v61 = vld [vmem:[%s3353_s0 + $0x78] sm:$0xff] }
 0x300   :  { %v1760_v59 = vmul.f32 -1.442695, %v504_v56 }
 0x301   :  { %2460 = vpow2.f32 %v1759_v57 }
 0x302   :  { %2462 = vpow2.f32 %v1760_v59  ;;  %v1764_v59 = vld [vmem:[%s3353_s0 + $0x70] sm:$0xff] }
 0x303   :  { %2464 = vtanh.f32 %v575_v1 }
 0x304   :  { %2466 = vpow2.f32 %v1761_v2 }
 0x30b   :  { %v2461_v5 = vpop.eup %2460 }
 0x30c   :  { %v586_v6 = vadd.f32 1.0, %v2461_v5  ;;  %v2463_v11 = vpop.eup %2462 }
 0x30d   :  { %v587_v12 = vadd.f32 1.0, %v2463_v11  ;;  %v2465_v13 = vpop.eup %2464 }
 0x30e   :  { %2468 = vrcp.f32 %v586_v6  ;;  %v2467_v16 = vpop.eup %2466 }
 0x30f   :  { %2470 = vrcp.f32 %v587_v12  ;;  %v588_v23 = vadd.f32 1.0, %v2467_v16 }
 0x311   :  { %2472 = vrcp.f32 %v588_v23 }
 0x318   :  { %v2469_v19 = vpop.eup %2468 }
 0x319   :  { %v597_v20 = vmul.f32 %v2469_v19, %v2465_v13  ;;  %v2471_v21 = vpop.eup %2470 }
 0x31a   :  { %v596_v28 = vmul.f32 %v2471_v21, %v3001_v34  ;;  %v1762_v34 = vld [vmem:[%s3353_s0 + $0x60] sm:$0xff] }
 0x31b   :  { %v2473_v36 = vpop.eup %2472 }
 0x31c   :  { %v3051_v29 = vadd.f32 %v597_v20, %v596_v28 }
 0x31e   :  { %2474 = vtanh.f32 %v3051_v29 }
 0x328   :  { %v2475_v38 = vpop.eup %2474 }
 0x329   :  { %v600_v43 = vmul.f32 %v2475_v38, %v2473_v36 }
 0x32b   :  { %671 = vmatmul.mubr.f32.vlgmr.msra.gmra.mrb[6].mxu0 %v600_v43  ;;  %742 = vmatmul.mubr.f32.vlgmr.msra.gmra.mrb[6].mxu1 %v600_v43 }
 0x32c   :  { %2095 = vmatpush1.bf16.msra.mxu0 %v2633_v8  ;;  %2127 = vmatpush1.bf16.msra.mxu1 %v2682_v25 }
 0x32d   :  { %2097 = vmatprep.subr.bf16.mxu0 %v2635_v9  ;;  %2129 = vmatprep.subr.bf16.mxu1 %v2707_v33 }
 0x32e   :  { %841 = vmatprep.mubr.f32.mxu0 %v2572_v3  ;;  %912 = vmatprep.mubr.f32.mxu1 %v2572_v3 }
 0x330   :  { %2099 = vmatpush1.bf16.msra.mxu0 %v2651_v14  ;;  %2131 = vmatpush1.bf16.msra.mxu1 %v2718_v37 }
 0x331   :  { %2101 = vmatprep.subr.bf16.mxu0 %v2660_v17  ;;  %2133 = vmatprep.subr.bf16.mxu1 %v2742_v45 }
 0x334   :  { %2103 = vmatpush1.bf16.msra.mxu0 %v2685_v26  ;;  %2135 = vmatpush1.bf16.msra.mxu1 %v2751_v48 }
 0x335   :  { %2105 = vmatprep.subr.bf16.mxu0 %v2698_v30  ;;  %2137 = vmatprep.subr.bf16.mxu1 %v2763_v52 }
 0x338   :  { %2107 = vmatpush1.bf16.msra.mxu0 %v2734_v42  ;;  %2139 = vmatpush1.bf16.msra.mxu1 %v2793_v62 }
 0x339   :  { %2109 = vmatprep.subr.bf16.mxu0 %v2745_v46  ;;  %2141 = vmatprep.subr.bf16.mxu1 %v2799_v0 }
 0x33c   :  { %2111 = vmatpush1.bf16.msra.mxu0 %v2772_v55  ;;  %2143 = vmatpush1.bf16.msra.mxu1 %v2829_v15 }
 0x33d   :  { %2113 = vmatprep.subr.bf16.mxu0 %v2781_v58  ;;  %2145 = vmatprep.subr.bf16.mxu1 %v2835_v18 }
 0x340   :  { %2115 = vmatpush1.bf16.msra.mxu0 %v2814_v7  ;;  %2147 = vmatpush1.bf16.msra.mxu1 %v2862_v31 }
 0x341   :  { %2117 = vmatprep.subr.bf16.mxu0 %v2817_v10  ;;  %2149 = vmatprep.subr.bf16.mxu1 %v2865_v32 }
 0x344   :  { %2119 = vmatpush1.bf16.msra.mxu0 %v2850_v24  ;;  %2151 = vmatpush1.bf16.msra.mxu1 %v2884_v40 }
 0x345   :  { %2121 = vmatprep.subr.bf16.mxu0 %v2853_v27  ;;  %2153 = vmatprep.subr.bf16.mxu1 %v2887_v41 }
 0x348   :  { %2123 = vmatpush1.bf16.msra.mxu0 %v2880_v39  ;;  %2155 = vmatpush1.bf16.msra.mxu1 %v2897_v47 }
 0x349   :  { %2157 = vmatprep.subr.bf16.mxu0 %v2622_v4  ;;  %2189 = vmatprep.subr.bf16.mxu1 %v2674_v22 }
 0x3fe   :  { %v672_v44 = vpop.f32.mrb[6].mxu0  ;;  %v743_v49 = vpop.f32.mrb[6].mxu1 }
 0x3ff   :  { %v673_v50 = vadd.f32 %v1762_v34, %v672_v44  ;;  %v674_v51 = vpop.f32.mrb[7].mxu0  ;;  %v745_v53 = vpop.f32.mrb[7].mxu1  ;;  %v744_v60 = vadd.f32 %v1764_v59, %v743_v49  ;;  %v1770_v34 = vld [vmem:[%s3353_s0 + $0x88] sm:$0xff] }
 0x400   :  { %v675_v54 = vadd.f32 %v1763_v35, %v674_v51  ;;  %v746_v63 = vadd.f32 %v1765_v61, %v745_v53 }
 0x401   :  { %v1766_v56 = vmul.f32 -1.442695, %v673_v50  ;;  %v1768_v1 = vmul.f32 -1.442695, %v744_v60  ;;  %v1772_v60 = vld [vmem:[%s3353_s0 + $0x98] sm:$0xff] }
 0x402   :  { %v1767_v57 = vmul.f32 -1.442695, %v675_v54 }
 0x403   :  { %2476 = vpow2.f32 %v1766_v56 }
 0x404   :  { %2478 = vpow2.f32 %v1767_v57  ;;  %v1771_v57 = vld [vmem:[%s3353_s0 + $0x90] sm:$0xff] }
 0x405   :  { %2480 = vtanh.f32 %v746_v63 }
 0x406   :  { %2482 = vpow2.f32 %v1768_v1 }
 0x40d   :  { %v2477_v2 = vpop.eup %2476 }
 0x40e   :  { %v757_v5 = vadd.f32 1.0, %v2477_v2  ;;  %v2479_v6 = vpop.eup %2478 }
 0x40f   :  { %v758_v11 = vadd.f32 1.0, %v2479_v6  ;;  %v2481_v12 = vpop.eup %2480 }
 0x410   :  { %2484 = vrcp.f32 %v757_v5  ;;  %v2483_v13 = vpop.eup %2482 }
 0x411   :  { %2486 = vrcp.f32 %v758_v11  ;;  %v759_v21 = vadd.f32 1.0, %v2483_v13 }
 0x413   :  { %2488 = vrcp.f32 %v759_v21 }
 0x41a   :  { %v2485_v16 = vpop.eup %2484 }
 0x41b   :  { %v768_v19 = vmul.f32 %v2485_v16, %v2481_v12  ;;  %v2487_v20 = vpop.eup %2486 }
 0x41c   :  { %v767_v23 = vmul.f32 %v2487_v20, %v3051_v29  ;;  %v1769_v29 = vld [vmem:[%s3353_s0 + $0x80] sm:$0xff] }
 0x41d   :  { %v2489_v36 = vpop.eup %2488 }
 0x41e   :  { %v3101_v28 = vadd.f32 %v768_v19, %v767_v23 }
 0x420   :  { %2490 = vtanh.f32 %v3101_v28 }
 0x42a   :  { %v2491_v38 = vpop.eup %2490 }
 0x42b   :  { %v771_v43 = vmul.f32 %v2491_v38, %v2489_v36 }
 0x42d   :  { %842 = vmatmul.mubr.f32.vlgmr.msra.gmra.mrb[8].mxu0 %v771_v43  ;;  %913 = vmatmul.mubr.f32.vlgmr.msra.gmra.mrb[8].mxu1 %v771_v43 }
 0x42e   :  { %2159 = vmatpush1.bf16.msra.mxu0 %v2633_v8  ;;  %2191 = vmatpush1.bf16.msra.mxu1 %v2682_v25 }
 0x42f   :  { %2161 = vmatprep.subr.bf16.mxu0 %v2635_v9  ;;  %2193 = vmatprep.subr.bf16.mxu1 %v2707_v33 }
 0x430   :  { %1012 = vmatprep.mubr.f32.mxu0 %v2572_v3  ;;  %1083 = vmatprep.mubr.f32.mxu1 %v2572_v3 }
 0x432   :  { %2163 = vmatpush1.bf16.msra.mxu0 %v2651_v14  ;;  %2195 = vmatpush1.bf16.msra.mxu1 %v2718_v37 }
 0x433   :  { %2165 = vmatprep.subr.bf16.mxu0 %v2660_v17  ;;  %2197 = vmatprep.subr.bf16.mxu1 %v2742_v45 }
 0x436   :  { %2167 = vmatpush1.bf16.msra.mxu0 %v2685_v26  ;;  %2199 = vmatpush1.bf16.msra.mxu1 %v2751_v48 }
 0x437   :  { %2169 = vmatprep.subr.bf16.mxu0 %v2698_v30  ;;  %2201 = vmatprep.subr.bf16.mxu1 %v2763_v52 }
 0x43a   :  { %2171 = vmatpush1.bf16.msra.mxu0 %v2734_v42  ;;  %2203 = vmatpush1.bf16.msra.mxu1 %v2793_v62 }
 0x43b   :  { %2173 = vmatprep.subr.bf16.mxu0 %v2745_v46  ;;  %2205 = vmatprep.subr.bf16.mxu1 %v2799_v0 }
 0x43e   :  { %2175 = vmatpush1.bf16.msra.mxu0 %v2772_v55  ;;  %2207 = vmatpush1.bf16.msra.mxu1 %v2829_v15 }
 0x43f   :  { %2177 = vmatprep.subr.bf16.mxu0 %v2781_v58  ;;  %2209 = vmatprep.subr.bf16.mxu1 %v2835_v18 }
 0x442   :  { %2179 = vmatpush1.bf16.msra.mxu0 %v2814_v7  ;;  %2211 = vmatpush1.bf16.msra.mxu1 %v2862_v31 }
 0x443   :  { %2181 = vmatprep.subr.bf16.mxu0 %v2817_v10  ;;  %2213 = vmatprep.subr.bf16.mxu1 %v2865_v32 }
 0x446   :  { %2183 = vmatpush1.bf16.msra.mxu0 %v2850_v24  ;;  %2215 = vmatpush1.bf16.msra.mxu1 %v2884_v40 }
 0x447   :  { %2185 = vmatprep.subr.bf16.mxu0 %v2853_v27  ;;  %2217 = vmatprep.subr.bf16.mxu1 %v2887_v41 }
 0x44a   :  { %2187 = vmatpush1.bf16.msra.mxu0 %v2880_v39  ;;  %2219 = vmatpush1.bf16.msra.mxu1 %v2897_v47 }
 0x44b   :  { %2221 = vmatprep.subr.bf16.mxu0 %v2622_v4  ;;  %2253 = vmatprep.subr.bf16.mxu1 %v2674_v22 }
 0x500   :  { %v843_v35 = vpop.f32.mrb[8].mxu0  ;;  %v914_v44 = vpop.f32.mrb[8].mxu1 }
 0x501   :  { %v844_v49 = vadd.f32 %v1769_v29, %v843_v35  ;;  %v845_v50 = vpop.f32.mrb[9].mxu0  ;;  %v916_v51 = vpop.f32.mrb[9].mxu1  ;;  %v915_v59 = vadd.f32 %v1771_v57, %v914_v44  ;;  %v1777_v29 = vld [vmem:[%s3353_s0 + $0xa8] sm:$0xff] }
 0x502   :  { %v846_v53 = vadd.f32 %v1770_v34, %v845_v50  ;;  %v917_v61 = vadd.f32 %v1772_v60, %v916_v51 }
 0x503   :  { %v1773_v54 = vmul.f32 -1.442695, %v844_v49  ;;  %v1775_v63 = vmul.f32 -1.442695, %v915_v59  ;;  %v1779_v59 = vld [vmem:[%s3353_s0 + $0xb8] sm:$0xff] }
 0x504   :  { %v1774_v56 = vmul.f32 -1.442695, %v846_v53 }
 0x505   :  { %2492 = vpow2.f32 %v1773_v54 }
 0x506   :  { %2494 = vpow2.f32 %v1774_v56  ;;  %v1778_v56 = vld [vmem:[%s3353_s0 + $0xb0] sm:$0xff] }
 0x507   :  { %2496 = vtanh.f32 %v917_v61 }
 0x508   :  { %2498 = vpow2.f32 %v1775_v63 }
 0x50f   :  { %v2493_v1 = vpop.eup %2492 }
 0x510   :  { %v928_v2 = vadd.f32 1.0, %v2493_v1  ;;  %v2495_v5 = vpop.eup %2494 }
 0x511   :  { %v929_v6 = vadd.f32 1.0, %v2495_v5  ;;  %v2497_v11 = vpop.eup %2496 }
 0x512   :  { %2500 = vrcp.f32 %v928_v2  ;;  %v2499_v12 = vpop.eup %2498 }
 0x513   :  { %2502 = vrcp.f32 %v929_v6  ;;  %v930_v20 = vadd.f32 1.0, %v2499_v12 }
 0x515   :  { %2504 = vrcp.f32 %v930_v20 }
 0x51c   :  { %v2501_v13 = vpop.eup %2500 }
 0x51d   :  { %v939_v16 = vmul.f32 %v2501_v13, %v2497_v11  ;;  %v2503_v19 = vpop.eup %2502 }
 0x51e   :  { %v938_v21 = vmul.f32 %v2503_v19, %v3101_v28  ;;  %v1776_v28 = vld [vmem:[%s3353_s0 + $0xa0] sm:$0xff] }
 0x51f   :  { %v2505_v36 = vpop.eup %2504 }
 0x520   :  { %v3151_v23 = vadd.f32 %v939_v16, %v938_v21 }
 0x522   :  { %2506 = vtanh.f32 %v3151_v23 }
 0x52c   :  { %v2507_v38 = vpop.eup %2506 }
 0x52d   :  { %v942_v43 = vmul.f32 %v2507_v38, %v2505_v36 }
 0x52f   :  { %1013 = vmatmul.mubr.f32.vlgmr.msra.gmra.mrb[10].mxu0 %v942_v43  ;;  %1084 = vmatmul.mubr.f32.vlgmr.msra.gmra.mrb[10].mxu1 %v942_v43 }
 0x530   :  { %2223 = vmatpush1.bf16.msra.mxu0 %v2633_v8  ;;  %2255 = vmatpush1.bf16.msra.mxu1 %v2682_v25 }
 0x531   :  { %2225 = vmatprep.subr.bf16.mxu0 %v2635_v9  ;;  %2257 = vmatprep.subr.bf16.mxu1 %v2707_v33 }
 0x532   :  { %1183 = vmatprep.mubr.f32.mxu0 %v2572_v3  ;;  %1254 = vmatprep.mubr.f32.mxu1 %v2572_v3 }
 0x534   :  { %2227 = vmatpush1.bf16.msra.mxu0 %v2651_v14  ;;  %2259 = vmatpush1.bf16.msra.mxu1 %v2718_v37 }
 0x535   :  { %2229 = vmatprep.subr.bf16.mxu0 %v2660_v17  ;;  %2261 = vmatprep.subr.bf16.mxu1 %v2742_v45 }
 0x538   :  { %2231 = vmatpush1.bf16.msra.mxu0 %v2685_v26  ;;  %2263 = vmatpush1.bf16.msra.mxu1 %v2751_v48 }
 0x539   :  { %2233 = vmatprep.subr.bf16.mxu0 %v2698_v30  ;;  %2265 = vmatprep.subr.bf16.mxu1 %v2763_v52 }
 0x53c   :  { %2235 = vmatpush1.bf16.msra.mxu0 %v2734_v42  ;;  %2267 = vmatpush1.bf16.msra.mxu1 %v2793_v62 }
 0x53d   :  { %2237 = vmatprep.subr.bf16.mxu0 %v2745_v46  ;;  %2269 = vmatprep.subr.bf16.mxu1 %v2799_v0 }
 0x540   :  { %2239 = vmatpush1.bf16.msra.mxu0 %v2772_v55  ;;  %2271 = vmatpush1.bf16.msra.mxu1 %v2829_v15 }
 0x541   :  { %2241 = vmatprep.subr.bf16.mxu0 %v2781_v58  ;;  %2273 = vmatprep.subr.bf16.mxu1 %v2835_v18 }
 0x544   :  { %2243 = vmatpush1.bf16.msra.mxu0 %v2814_v7  ;;  %2275 = vmatpush1.bf16.msra.mxu1 %v2862_v31 }
 0x545   :  { %2245 = vmatprep.subr.bf16.mxu0 %v2817_v10  ;;  %2277 = vmatprep.subr.bf16.mxu1 %v2865_v32 }
 0x548   :  { %2247 = vmatpush1.bf16.msra.mxu0 %v2850_v24  ;;  %2279 = vmatpush1.bf16.msra.mxu1 %v2884_v40 }
 0x549   :  { %2249 = vmatprep.subr.bf16.mxu0 %v2853_v27  ;;  %2281 = vmatprep.subr.bf16.mxu1 %v2887_v41 }
 0x54c   :  { %2251 = vmatpush1.bf16.msra.mxu0 %v2880_v39  ;;  %2283 = vmatpush1.bf16.msra.mxu1 %v2897_v47 }
 0x54d   :  { %2285 = vmatprep.subr.bf16.mxu0 %v2622_v4  ;;  %2317 = vmatprep.subr.bf16.mxu1 %v2674_v22 }
 0x602   :  { %v1014_v34 = vpop.f32.mrb[10].mxu0  ;;  %v1085_v35 = vpop.f32.mrb[10].mxu1 }
 0x603   :  { %v1015_v44 = vadd.f32 %v1776_v28, %v1014_v34  ;;  %v1016_v49 = vpop.f32.mrb[11].mxu0  ;;  %v1087_v50 = vpop.f32.mrb[11].mxu1  ;;  %v1086_v57 = vadd.f32 %v1778_v56, %v1085_v35  ;;  %v1784_v28 = vld [vmem:[%s3353_s0 + $0xc8] sm:$0xff] }
 0x604   :  { %v1017_v51 = vadd.f32 %v1777_v29, %v1016_v49  ;;  %v1088_v60 = vadd.f32 %v1779_v59, %v1087_v50 }
 0x605   :  { %v1780_v53 = vmul.f32 -1.442695, %v1015_v44  ;;  %v1782_v61 = vmul.f32 -1.442695, %v1086_v57 }
 0x606   :  { %v1781_v54 = vmul.f32 -1.442695, %v1017_v51 }
 0x607   :  { %2508 = vpow2.f32 %v1780_v53 }
 0x608   :  { %2510 = vpow2.f32 %v1781_v54  ;;  %v1786_v54 = vld [vmem:[%s3353_s0 + $0xd8] sm:$0xff] }
 0x609   :  { %2512 = vtanh.f32 %v1088_v60 }
 0x60a   :  { %2514 = vpow2.f32 %v1782_v61 }
 0x611   :  { %v2509_v63 = vpop.eup %2508 }
 0x612   :  { %v1099_v1 = vadd.f32 1.0, %v2509_v63  ;;  %v2511_v2 = vpop.eup %2510 }
 0x613   :  { %v1100_v5 = vadd.f32 1.0, %v2511_v2  ;;  %v2513_v6 = vpop.eup %2512 }
 0x614   :  { %2516 = vrcp.f32 %v1099_v1  ;;  %v2515_v11 = vpop.eup %2514 }
 0x615   :  { %2518 = vrcp.f32 %v1100_v5  ;;  %v1101_v19 = vadd.f32 1.0, %v2515_v11 }
 0x617   :  { %2520 = vrcp.f32 %v1101_v19 }
 0x61e   :  { %v2517_v12 = vpop.eup %2516 }
 0x61f   :  { %v1110_v13 = vmul.f32 %v2517_v12, %v2513_v6  ;;  %v2519_v16 = vpop.eup %2518 }
 0x620   :  { %v1109_v20 = vmul.f32 %v2519_v16, %v3151_v23  ;;  %v1783_v23 = vld [vmem:[%s3353_s0 + $0xc0] sm:$0xff] }
 0x621   :  { %v2521_v36 = vpop.eup %2520 }
 0x622   :  { %v3201_v21 = vadd.f32 %v1110_v13, %v1109_v20 }
 0x624   :  { %2522 = vtanh.f32 %v3201_v21 }
 0x62e   :  { %v2523_v38 = vpop.eup %2522 }
 0x62f   :  { %v1113_v43 = vmul.f32 %v2523_v38, %v2521_v36  ;;  %v1627_v38 = vld [vmem:[%s3354_s2] sm:$0xff] }
 0x631   :  { %1184 = vmatmul.mubr.f32.vlgmr.msra.gmra.mrb[12].mxu0 %v1113_v43  ;;  %1255 = vmatmul.mubr.f32.vlgmr.msra.gmra.mrb[12].mxu1 %v1113_v43  ;;  %v1628_v43 = vld [vmem:[%s3354_s2 + $0x8] sm:$0xff] }
 0x632   :  { %2287 = vmatpush1.bf16.msra.mxu0 %v2633_v8  ;;  %2319 = vmatpush1.bf16.msra.mxu1 %v2682_v25 }
 0x633   :  { %2289 = vmatprep.subr.bf16.mxu0 %v2635_v9  ;;  %2321 = vmatprep.subr.bf16.mxu1 %v2707_v33 }
 0x634   :  { %1354 = vmatprep.mubr.f32.mxu0 %v2572_v3  ;;  %1425 = vmatprep.mubr.f32.mxu1 %v2572_v3 }
 0x636   :  { %2291 = vmatpush1.bf16.msra.mxu0 %v2651_v14  ;;  %2323 = vmatpush1.bf16.msra.mxu1 %v2718_v37 }
 0x637   :  { %2293 = vmatprep.subr.bf16.mxu0 %v2660_v17  ;;  %2325 = vmatprep.subr.bf16.mxu1 %v2742_v45 }
 0x63a   :  { %2295 = vmatpush1.bf16.msra.mxu0 %v2685_v26  ;;  %2327 = vmatpush1.bf16.msra.mxu1 %v2751_v48 }
 0x63b   :  { %2297 = vmatprep.subr.bf16.mxu0 %v2698_v30  ;;  %2329 = vmatprep.subr.bf16.mxu1 %v2763_v52 }
 0x63e   :  { %2299 = vmatpush1.bf16.msra.mxu0 %v2734_v42  ;;  %2331 = vmatpush1.bf16.msra.mxu1 %v2793_v62 }
 0x63f   :  { %2301 = vmatprep.subr.bf16.mxu0 %v2745_v46  ;;  %2333 = vmatprep.subr.bf16.mxu1 %v2799_v0 }
 0x642   :  { %2303 = vmatpush1.bf16.msra.mxu0 %v2772_v55  ;;  %2335 = vmatpush1.bf16.msra.mxu1 %v2829_v15 }
 0x643   :  { %2305 = vmatprep.subr.bf16.mxu0 %v2781_v58  ;;  %2337 = vmatprep.subr.bf16.mxu1 %v2835_v18 }
 0x646   :  { %2307 = vmatpush1.bf16.msra.mxu0 %v2814_v7  ;;  %2339 = vmatpush1.bf16.msra.mxu1 %v2862_v31 }
 0x647   :  { %2309 = vmatprep.subr.bf16.mxu0 %v2817_v10  ;;  %2341 = vmatprep.subr.bf16.mxu1 %v2865_v32 }
 0x64a   :  { %2311 = vmatpush1.bf16.msra.mxu0 %v2850_v24  ;;  %2343 = vmatpush1.bf16.msra.mxu1 %v2884_v40 }
 0x64b   :  { %2313 = vmatprep.subr.bf16.mxu0 %v2853_v27  ;;  %2345 = vmatprep.subr.bf16.mxu1 %v2887_v41 }
 0x64e   :  { %2315 = vmatpush1.bf16.msra.mxu0 %v2880_v39  ;;  %2347 = vmatpush1.bf16.msra.mxu1 %v2897_v47 }
 0x64f   :  { %2349 = vmatprep.subr.bf16.mxu0 %v2622_v4  ;;  %2381 = vmatprep.subr.bf16.mxu1 %v2674_v22  ;;  %v1785_v4 = vld [vmem:[%s3353_s0 + $0xd0] sm:$0xff] }
 0x704   :  { %v1185_v29 = vpop.f32.mrb[12].mxu0  ;;  %v1256_v34 = vpop.f32.mrb[12].mxu1 }
 0x705   :  { %v1186_v35 = vadd.f32 %v1783_v23, %v1185_v29  ;;  %v1187_v44 = vpop.f32.mrb[13].mxu0  ;;  %v1258_v49 = vpop.f32.mrb[13].mxu1  ;;  %v1257_v22 = vadd.f32 %v1785_v4, %v1256_v34  ;;  %v1629_v23 = vld [vmem:[%s3354_s2 + $0x10] sm:$0xff]  ;;  %v1630_v29 = vld [vmem:[%s3354_s2 + $0x18] sm:$0xff]  ;;  %v1798_v4 = vld [vmem:[%s3353_s0 + $0x108] sm:$0xff] }
 0x706   :  { %v1188_v50 = vadd.f32 %v1784_v28, %v1187_v44  ;;  %v1259_v56 = vadd.f32 %v1786_v54, %v1258_v49  ;;  %v2413_v28 = vpack.c.bf16 %v1628_v43, %v1627_v38  ;;  %v2416_v34 = vpack.c.bf16 %v1630_v29, %v1629_v23  ;;  %v1632_v44 = vld [vmem:[%s3354_s2 + $0x28] sm:$0xff] }
 0x707   :  { %v1787_v51 = vmul.f32 -1.442695, %v1186_v35  ;;  %v1789_v57 = vmul.f32 -1.442695, %v1257_v22  ;;  %v1631_v35 = vld [vmem:[%s3354_s2 + $0x20] sm:$0xff] }
 0x708   :  { %v1788_v53 = vmul.f32 -1.442695, %v1188_v50  ;;  %v2419_v49 = vpack.c.bf16 %v1632_v44, %v1631_v35  ;;  %v1634_v50 = vld [vmem:[%s3354_s2 + $0x38] sm:$0xff] }
 0x709   :  { %2524 = vpow2.f32 %v1787_v51 }
 0x70a   :  { %2526 = vpow2.f32 %v1788_v53  ;;  %v1797_v53 = vld [vmem:[%s3353_s0 + $0x100] sm:$0xff] }
 0x70b   :  { %2528 = vtanh.f32 %v1259_v56 }
 0x70c   :  { %2530 = vpow2.f32 %v1789_v57 }
 0x713   :  { %v2525_v59 = vpop.eup %2524 }
 0x714   :  { %v1270_v60 = vadd.f32 1.0, %v2525_v59  ;;  %v2527_v61 = vpop.eup %2526 }
 0x715   :  { %v1271_v63 = vadd.f32 1.0, %v2527_v61  ;;  %v2529_v1 = vpop.eup %2528 }
 0x716   :  { %2532 = vrcp.f32 %v1270_v60  ;;  %v2531_v2 = vpop.eup %2530 }
 0x717   :  { %2534 = vrcp.f32 %v1271_v63  ;;  %v1272_v12 = vadd.f32 1.0, %v2531_v2 }
 0x719   :  { %2536 = vrcp.f32 %v1272_v12 }
 0x720   :  { %v2533_v5 = vpop.eup %2532 }
 0x721   :  { %v1281_v6 = vmul.f32 %v2533_v5, %v2529_v1  ;;  %v2535_v11 = vpop.eup %2534  ;;  %v1799_v1 = vld [vmem:[%s3353_s0 + $0x110] sm:$0xff]  ;;  %v1800_v5 = vld [vmem:[%s3353_s0 + $0x118] sm:$0xff] }
 0x722   :  { %v1280_v13 = vmul.f32 %v2535_v11, %v3201_v21  ;;  %v2573_v21 = vmov 0.0|0.0  }
 0x723   :  { %v2537_v19 = vpop.eup %2536 }
 0x724   :  { %v3251_v16 = vadd.f32 %v1281_v6, %v1280_v13 }
 0x726   :  { %2538 = vtanh.f32 %v3251_v16 }
 0x730   :  { %v2539_v20 = vpop.eup %2538 }
 0x731   :  { %v1284_v36 = vmul.f32 %v2539_v20, %v2537_v19 }
 0x733   :  { %1355 = vmatmul.mubr.f32.vlgmr.msra.gmra.mrb[14].mxu0 %v1284_v36  ;;  %1426 = vmatmul.mubr.f32.vlgmr.msra.gmra.mrb[14].mxu1 %v1284_v36 }
 0x734   :  { %2351 = vmatpush1.bf16.msra.mxu0 %v2633_v8  ;;  %2383 = vmatpush1.bf16.msra.mxu1 %v2682_v25  ;;  %v1790_v8 = vld [vmem:[%s3353_s0 + $0xe0] sm:$0xff] }
 0x735   :  { %2353 = vmatprep.subr.bf16.mxu0 %v2635_v9  ;;  %2385 = vmatprep.subr.bf16.mxu1 %v2707_v33  ;;  %v1791_v9 = vld [vmem:[%s3353_s0 + $0xe8] sm:$0xff] }
 0x736   :  { %1525 = vmatprep.mubr.f32.mxu0 %v2572_v3  ;;  %1596 = vmatprep.mubr.f32.mxu1 %v2572_v3 }
 0x738   :  { %2355 = vmatpush1.bf16.msra.mxu0 %v2651_v14  ;;  %2387 = vmatpush1.bf16.msra.mxu1 %v2718_v37 }
 0x739   :  { %2357 = vmatprep.subr.bf16.mxu0 %v2660_v17  ;;  %2389 = vmatprep.subr.bf16.mxu1 %v2742_v45  ;;  %v1792_v45 = vld [vmem:[%s3353_s0 + $0xf0] sm:$0xff] }
 0x73c   :  { %2359 = vmatpush1.bf16.msra.mxu0 %v2685_v26  ;;  %2391 = vmatpush1.bf16.msra.mxu1 %v2751_v48  ;;  %v1793_v48 = vld [vmem:[%s3353_s0 + $0xf8] sm:$0xff]  ;;  %s2575_s0 = smov 64  }
 0x73d   :  { %2361 = vmatprep.subr.bf16.mxu0 %v2698_v30  ;;  %2393 = vmatprep.subr.bf16.mxu1 %v2763_v52 }
 0x740   :  { %2363 = vmatpush1.bf16.msra.mxu0 %v2734_v42  ;;  %2395 = vmatpush1.bf16.msra.mxu1 %v2793_v62 }
 0x741   :  { %2365 = vmatprep.subr.bf16.mxu0 %v2745_v46  ;;  %2397 = vmatprep.subr.bf16.mxu1 %v2799_v0 }
 0x744   :  { %2367 = vmatpush1.bf16.msra.mxu0 %v2772_v55  ;;  %2399 = vmatpush1.bf16.msra.mxu1 %v2829_v15 }
 0x745   :  { %2369 = vmatprep.subr.bf16.mxu0 %v2781_v58  ;;  %2401 = vmatprep.subr.bf16.mxu1 %v2835_v18 }
 0x748   :  { %2371 = vmatpush1.bf16.msra.mxu0 %v2814_v7  ;;  %2403 = vmatpush1.bf16.msra.mxu1 %v2862_v31 }
 0x749   :  { %2373 = vmatprep.subr.bf16.mxu0 %v2817_v10  ;;  %2405 = vmatprep.subr.bf16.mxu1 %v2865_v32 }
 0x74c   :  { %2375 = vmatpush1.bf16.msra.mxu0 %v2850_v24  ;;  %2407 = vmatpush1.bf16.msra.mxu1 %v2884_v40 }
 0x74d   :  { %2377 = vmatprep.subr.bf16.mxu0 %v2853_v27  ;;  %2409 = vmatprep.subr.bf16.mxu1 %v2887_v41 }
 0x750   :  { %2379 = vmatpush1.bf16.msra.mxu0 %v2880_v39  ;;  %2411 = vmatpush1.bf16.msra.mxu1 %v2897_v47 }
 0x751   :  { %2412 = vmatprep.subr.bf16.mxu0 %v2573_v21 }
 0x806   :  { %v1356_v14 = vpop.f32.mrb[14].mxu0  ;;  %v1427_v17 = vpop.f32.mrb[14].mxu1 }
 0x807   :  { %v1357_v25 = vadd.f32 %v1790_v8, %v1356_v14  ;;  %v1358_v26 = vpop.f32.mrb[15].mxu0  ;;  %v1429_v30 = vpop.f32.mrb[15].mxu1  ;;  %v1428_v46 = vadd.f32 %v1792_v45, %v1427_v17  ;;  %v11_v45 = vstv %s3355_s5 }
 0x808   :  { %v1359_v33 = vadd.f32 %v1791_v9, %v1358_v26  ;;  %v1430_v52 = vadd.f32 %v1793_v48, %v1429_v30  ;;  %12 = vst [vmem:[#allocation2] sm:$0x1] %v11_v45 }
 0x809   :  { %v1794_v37 = vmul.f32 -1.442695, %v1357_v25  ;;  %v1796_v55 = vmul.f32 -1.442695, %v1428_v46  ;;  %v1804_v46 = vld [vmem:[%s3356_s3] ss:$0 sm:$0xff] }
 0x80a   :  { %v1795_v42 = vmul.f32 -1.442695, %v1359_v33 }
 0x80b   :  { %2540 = vpow2.f32 %v1794_v37 }
 0x80c   :  { %2542 = vpow2.f32 %v1795_v42 }
 0x80d   :  { %2544 = vtanh.f32 %v1430_v52 }
 0x80e   :  { %2546 = vpow2.f32 %v1796_v55 }
 0x815   :  { %v2541_v58 = vpop.eup %2540 }
 0x816   :  { %v1441_v62 = vadd.f32 1.0, %v2541_v58  ;;  %v2543_v0 = vpop.eup %2542  ;;  %v1806_v58 = vld [vmem:[%s3357_s4] ss:$0 sm:$0xff] }
 0x817   :  { %v1442_v7 = vadd.f32 1.0, %v2543_v0  ;;  %v2545_v10 = vpop.eup %2544 }
 0x818   :  { %2548 = vrcp.f32 %v1441_v62  ;;  %v2547_v15 = vpop.eup %2546 }
 0x819   :  { %2550 = vrcp.f32 %v1442_v7  ;;  %v1443_v31 = vadd.f32 1.0, %v2547_v15 }
 0x81b   :  { %2552 = vrcp.f32 %v1443_v31 }
 0x822   :  { %v2549_v18 = vpop.eup %2548 }
 0x823   :  { %v1452_v24 = vmul.f32 %v2549_v18, %v2545_v10  ;;  %v2551_v27 = vpop.eup %2550  ;;  %v1807_v10 = vld [vmem:[#allocation2] ss:$0 sm:$0xff] }
 0x824   :  { %v1451_v32 = vmul.f32 %v2551_v27, %v3251_v16 }
 0x825   :  { %v2553_v40 = vpop.eup %2552 }
 0x826   :  { %v3299_v39 = vadd.f32 %v1452_v24, %v1451_v32 }
 0x828   :  { %2554 = vtanh.f32 %v3299_v39 }
 0x832   :  { %v2555_v41 = vpop.eup %2554 }
 0x833   :  { %v1455_v47 = vmul.f32 %v2555_v41, %v2553_v40 }
 0x835   :  { %1526 = vmatmul.mubr.f32.vlgmr.msra.gmra.mrb[16].mxu0 %v1455_v47  ;;  %1597 = vmatmul.mubr.f32.vlgmr.msra.gmra.mrb[16].mxu1 %v1455_v47 }
 0x836   :  { %1833 = vmatprep.mubr.msk.f32.mxu0 %vm2574_vm0, %v2572_v3  ;;  %2414 = vmatpush3.bf16.msra.mxu0 %v2413_v28  ;;  %v1633_v3 = vld [vmem:[%s3354_s2 + $0x30] sm:$0xff] }
 0x837   :  { %2415 = vmatprep.subr.bf16.mxu0 %v2573_v21  ;;  %v2422_v51 = vpack.c.bf16 %v1634_v50, %v1633_v3 }
 0x83a   :  { %2417 = vmatpush3.bf16.msra.mxu0 %v2416_v34 }
 0x83b   :  { %2418 = vmatprep.subr.bf16.mxu0 %v2573_v21 }
 0x83e   :  { %2420 = vmatpush3.bf16.msra.mxu0 %v2419_v49 }
 0x83f   :  { %2421 = vmatprep.subr.bf16.mxu0 %v2573_v21 }
 0x842   :  { %2423 = vmatpush3.bf16.msra.mxu0 %v2422_v51 }
 0x908   :  { %v1527_v22 = vpop.f32.mrb[16].mxu0  ;;  %v1598_v54 = vpop.f32.mrb[16].mxu1 }
 0x909   :  { %v1528_v56 = vadd.f32 %v1797_v53, %v1527_v22  ;;  %v1529_v57 = vpop.f32.mrb[17].mxu0  ;;  %v1600_v59 = vpop.f32.mrb[17].mxu1  ;;  %v1599_v2 = vadd.f32 %v1799_v1, %v1598_v54 }
 0x90a   :  { %v1530_v60 = vadd.f32 %v1798_v4, %v1529_v57  ;;  %v1601_v6 = vadd.f32 %v1800_v5, %v1600_v59 }
 0x90b   :  { %v1801_v61 = vmul.f32 -1.442695, %v1528_v56  ;;  %v1803_v11 = vmul.f32 -1.442695, %v1599_v2 }
 0x90c   :  { %v1802_v63 = vmul.f32 -1.442695, %v1530_v60 }
 0x90d   :  { %2556 = vpow2.f32 %v1801_v61 }
 0x90e   :  { %2558 = vpow2.f32 %v1802_v63 }
 0x90f   :  { %2560 = vtanh.f32 %v1601_v6 }
 0x910   :  { %2562 = vpow2.f32 %v1803_v11 }
 0x917   :  { %v2557_v12 = vpop.eup %2556 }
 0x918   :  { %v1612_v13 = vadd.f32 1.0, %v2557_v12  ;;  %v2559_v16 = vpop.eup %2558 }
 0x919   :  { %v1613_v19 = vadd.f32 1.0, %v2559_v16  ;;  %v2561_v20 = vpop.eup %2560 }
 0x91a   :  { %2564 = vrcp.f32 %v1612_v13  ;;  %v2563_v36 = vpop.eup %2562 }
 0x91b   :  { %2566 = vrcp.f32 %v1613_v19  ;;  %v1614_v17 = vadd.f32 1.0, %v2563_v36 }
 0x91d   :  { %2568 = vrcp.f32 %v1614_v17 }
 0x924   :  { %v2565_v8 = vpop.eup %2564 }
 0x925   :  { %v1623_v9 = vmul.f32 %v2565_v8, %v2561_v20  ;;  %v2567_v14 = vpop.eup %2566 }
 0x926   :  { %v1622_v25 = vmul.f32 %v2567_v14, %v3299_v39 }
 0x927   :  { %v2569_v30 = vpop.eup %2568 }
 0x928   :  { %v1624_v26 = vadd.f32 %v1623_v9, %v1622_v25 }
 0x92a   :  { %2570 = vtanh.f32 %v1624_v26 }
 0x934   :  { %v2571_v33 = vpop.eup %2570 }
 0x935   :  { %v1626_v37 = vmul.f32 %v2571_v33, %v2569_v30 }
 0x937   :  { %1643 = vrot.lane.b32.xlu0 %v1626_v37, %s2575_s0 }
 0x9a9   :  { %v1644_v42 = vpop.permute.xlu0 %1643 }
 0x9aa   :  { %1834 = vmatmul.mubr.msk.f32.vlgmr.msra.gmra.mrb[18].mxu0 %vm1645_vm1, %v1644_v42 }
 0xa7d   :  { %v1714_v48 = vpop.f32.mrb[18].mxu0 }
 0xa7e   :  { %v1715_v52 = vadd.f32 %v1804_v46, %v1714_v48  ;;  %v1835_v55 = vpop.f32.mrb[19].mxu0 }
 0xa80   :  { %v1718_v62 = vmax.f32 %v1715_v52, 0.0 }
 0xa82   :  { %v1726_v0 = vmul.f32 %v1806_v58, %v1718_v62 }
 0xa84   :  { %v1728_v7 = vsel %vm1727_vm2, %v1726_v0, 0.0 }
 0xa85   :  { %1729 = vadd.xlane.f32.xlu0 %v1728_v7 }
 0xb12   :  { %v1730_v15 = vpop.xlane.xlu0 %1729 }
 0xb13   :  { %v1738_v18 = vadd.f32 %v1807_v10, %v1730_v15 }
 0xb15   :  { %1740 = vst.msk [vmem:[%s3358_s6] sm:$0xff] %vm1739_vm3, %v1738_v18 }

</bundles_post_ra>
